<compile_context>
chip_gen: v5e
topology: v5e:2x2
jax: 0.10.0
libtpu: 0.0.40
codegen_flags: <defaults>
</compile_context>

<pallas_src>
import functools

import jax
import jax.numpy as jnp
from jax import lax
from jax.experimental import pallas as pl
from jax.experimental.pallas import tpu as pltpu


# ----------------------------------------------------------------------------
# Fused Pallas kernel: tree-conv + tanh + max-pool + hidden linear + head
# ----------------------------------------------------------------------------
def tbcnn_fused_kernel(tree_ref, ch_ref, wconv_ref, bconv_ref,
                       wh_ref, bh_ref, whead_ref, bhead_ref, out_ref,
                       *, n_trees, n_nodes):
    """Whole batch (both branches stacked) in one step.

    tree_ref : (C+1, M, F)  node + children feature vectors, M = n_trees*n_nodes
    ch_ref   : (M, C+1)     children indices, col 0 zero-padded, int32
    wconv    : (3F, CF)     fused conv weight (rows paired with [eta_t|eta_r|eta_l])
    bconv    : (1, CF)
    wh, bh   : (CF, H), (1, H)      hidden2label linear
    whead    : (H, L), bhead (1, L) folded hidden2labels->midlle->output linear
    out      : (n_trees//2, L)      softmax probabilities
    """
    c1, m, f = tree_ref.shape

    children = ch_ref[...]                                     # (M, C+1) int32
    coli = lax.broadcasted_iota(jnp.int32, (m, c1), 1)         # 0..C per column
    has_child = children != 0                                  # col 0 is padding
    mask = has_child.astype(jnp.float32)
    num_sib_i = jnp.sum(has_child.astype(jnp.int32), axis=-1, keepdims=True)
    num_sib = num_sib_i.astype(jnp.float32)                    # (M, 1)

    c_t = (coli == 0).astype(jnp.float32)                      # eta_t
    child_idx = (coli.astype(jnp.float32) - 1.0) * mask
    singles = jnp.where(coli == 1, jnp.float32(0.5), jnp.float32(0.0))
    denom = jnp.maximum(num_sib - 1.0, 1.0)                    # guarded, same fwd values
    c_r = jnp.where(num_sib_i == 1, singles,                   # eta_r
                    (1.0 - c_t) * child_idx / denom)
    c_l = (1.0 - c_t) * (1.0 - c_r) * mask                     # eta_l

    # Per-node mixing.  eta_t only hits column 0 -> a_t is just the node vector;
    # eta_r/eta_l are zero at column 0 -> start the unrolled loop at c=1.
    a_t = tree_ref[0]                                          # (M, F)
    a_r = jnp.zeros((m, f), jnp.float32)
    a_l = jnp.zeros((m, f), jnp.float32)
    for c in range(1, c1):
        tc = tree_ref[c]                                       # (M, F)
        a_r = a_r + c_r[:, c:c + 1] * tc
        a_l = a_l + c_l[:, c:c + 1] * tc

    # Single fused conv matmul (K = 3F) instead of three K = F matmuls.
    a_cat = jnp.concatenate([a_t, a_r, a_l], axis=-1)          # (M, 3F)
    conv = jnp.tanh(
        jnp.dot(a_cat, wconv_ref[...], preferred_element_type=jnp.float32)
        + bconv_ref[...])                                      # (M, CF)

    # Dynamic max-pool per tree (static unroll; slices are sublane-aligned).
    pooled = []
    for t in range(n_trees):
        blk = conv[t * n_nodes:(t + 1) * n_nodes, :]
        pooled.append(jnp.max(blk, axis=0, keepdims=True))
    pooled = jnp.concatenate(pooled, axis=0)                   # (n_trees, CF)

    hidden = (jnp.dot(pooled, wh_ref[...], preferred_element_type=jnp.float32)
              + bh_ref[...])                                   # (n_trees, H)

    # Classifier head: |lvec - rvec| -> folded linear -> softmax.
    b = n_trees // 2
    d = jnp.abs(hidden[:b, :] - hidden[b:, :])                 # (B, H)
    o = (jnp.dot(d, whead_ref[...], preferred_element_type=jnp.float32)
         + bhead_ref[...])                                     # (B, L)
    o = o - jnp.max(o, axis=-1, keepdims=True)
    e = jnp.exp(o)
    # NOTE: pl.reciprocal(..., approx=True) would move this to the EUP slot,
    # but exact division is kept for bit-tight parity with the reference.
    out_ref[...] = e / jnp.sum(e, axis=-1, keepdims=True)      # (B, L)


# ----------------------------------------------------------------------------
# Glue: embedding lookup, children gather, parameter prep, pallas_call wrapper
# ----------------------------------------------------------------------------
def build_tree_inputs(node_ids, children, emb_table):
    """Embedding + children_tensor gather (data-dependent gather kept in JAX)."""
    nodes = emb_table[node_ids]                                # (NB, N, F)
    nb, n, f = nodes.shape
    lookup = jnp.concatenate(
        [jnp.zeros((nb, 1, f), nodes.dtype), nodes[:, 1:, :]], axis=1)
    child_vecs = jax.vmap(lambda vl, ch: vl[ch])(lookup, children)   # (NB,N,C,F)
    tree = jnp.concatenate([nodes[:, :, None, :], child_vecs], axis=2)  # (NB,N,C+1,F)
    ch_pad = jnp.concatenate(
        [jnp.zeros((nb, n, 1), jnp.int32), children.astype(jnp.int32)], axis=2)
    return tree, ch_pad


def prep_conv_weight(w_t, w_l, w_r):
    """Reproduce the PyTorch reshape((B,N,3,F)) + tensordot index scramble,
    then lay rows out as [eta_t-block | eta_r-block | eta_l-block] so a single
    (M,3F)@(3F,CF) matmul matches torch exactly."""
    f, cf = w_t.shape
    w_flat = jnp.stack([w_t, w_r, w_l], axis=0).reshape(3 * f, cf)   # torch stack order
    w_prime = w_flat.reshape(f, 3, cf)                               # raw-reshape scramble
    return jnp.transpose(w_prime, (1, 0, 2)).reshape(3 * f, cf)      # (3F, CF)


def fold_head_params(w1, b1, w2, b2, w3, b3):
    """hidden2labels -> midllelayer -> outputlayer2 have no nonlinearity between
    them, so fold into a single affine map (mathematically identical)."""
    w = w1 @ w2 @ w3                                           # (H, L)
    b = b1 @ w2 @ w3 + b2 @ w3 + b3                            # (1, L)
    return w, b


@jax.jit
def tbcnn_classifier_forward(nodes1, children1, nodes2, children2, params):
    # Stack both branches on the batch axis -> one kernel launch, shared weights.
    node_ids = jnp.concatenate([nodes1, nodes2], axis=0)       # (2B, N)
    children = jnp.concatenate([children1, children2], axis=0) # (2B, N, C)
    tree, ch_pad = build_tree_inputs(node_ids, children, params["emb"])
    nb, n, c1, f = tree.shape

    # (C+1, 2B*N, F): each child slot is a contiguous 2D slab for the kernel.
    tree_cm = jnp.transpose(tree, (2, 0, 1, 3)).reshape(c1, nb * n, f)
    ch_flat = ch_pad.reshape(nb * n, c1)

    w_conv = prep_conv_weight(params["w_t"], params["w_l"], params["w_r"])
    w_head, b_head = fold_head_params(params["w1"], params["b1"],
                                      params["w2"], params["b2"],
                                      params["w3"], params["b3"])
    n_labels = w_head.shape[1]

    vmem = lambda: pl.BlockSpec(memory_space=pltpu.MemorySpace.VMEM)
    kernel = functools.partial(tbcnn_fused_kernel, n_trees=nb, n_nodes=n)
    return pl.pallas_call(
        kernel,
        out_shape=jax.ShapeDtypeStruct((nb // 2, n_labels), jnp.float32),
        in_specs=[vmem() for _ in range(8)],
        out_specs=vmem(),
    )(tree_cm, ch_flat, w_conv, params["b_conv"],
      params["w_hid"], params["b_hid"], w_head, b_head)


# ----------------------------------------------------------------------------
# Pure-JAX reference (mirrors the PyTorch code, incl. the reshape scramble)
# ----------------------------------------------------------------------------
def ref_conv_step(nodes, children, w_t, w_l, w_r, b_conv):
    b, n, f = nodes.shape
    c = children.shape[2]
    lookup = jnp.concatenate([jnp.zeros((b, 1, f)), nodes[:, 1:, :]], axis=1)
    child_vecs = jax.vmap(lambda vl, ch: vl[ch])(lookup, children)
    tree = jnp.concatenate([nodes[:, :, None, :], child_vecs], axis=2)

    chf = children.astype(jnp.float32)
    c_t = jnp.broadcast_to(
        jnp.concatenate([jnp.ones((n, 1)), jnp.zeros((n, c))], axis=1)[None],
        (b, n, c + 1))
    num_sib = jnp.broadcast_to(
        jnp.sum((chf != 0).astype(jnp.float32), axis=2, keepdims=True),
        (b, n, c + 1))
    mask = jnp.concatenate([jnp.zeros((b, n, 1)), jnp.minimum(chf, 1.0)], axis=2)
    child_idx = jnp.broadcast_to(
        jnp.arange(-1.0, c, 1.0)[None, None, :], (b, n, c + 1)) * mask
    singles = jnp.concatenate(
        [jnp.zeros((b, n, 1)), jnp.full((b, n, 1), 0.5), jnp.zeros((b, n, c - 1))],
        axis=2)
    c_r = jnp.where(num_sib == 1.0, singles,
                    (1.0 - c_t) * (child_idx / (num_sib - 1.0)))
    c_l = (1.0 - c_t) * (1.0 - c_r) * mask

    coef = jnp.stack([c_t, c_r, c_l], axis=3)                  # (B,N,C+1,3)
    weights = jnp.stack([w_t, w_r, w_l], axis=0)               # (3,F,CF)
    res = jnp.matmul(jnp.swapaxes(tree.reshape(b * n, c + 1, f), 1, 2),
                     coef.reshape(b * n, c + 1, 3))            # (B*N, F, 3)
    res = res.reshape(b, n, 3, f)                              # PyTorch raw reshape
    res = jnp.tensordot(res, weights, axes=[[2, 3], [0, 1]])   # (B, N, CF)
    return jnp.tanh(res + b_conv)


def ref_forward(nodes1, children1, nodes2, children2, params):
    def branch(nids, ch):
        nodes = params["emb"][nids]
        conv = ref_conv_step(nodes, ch, params["w_t"], params["w_l"],
                             params["w_r"], params["b_conv"])
        pooled = jnp.max(conv, axis=1)
        return pooled @ params["w_hid"] + params["b_hid"]

    l, r = branch(nodes1, children1), branch(nodes2, children2)
    d = jnp.abs(l - r)
    h = d @ params["w1"] + params["b1"]
    m = h @ params["w2"] + params["b2"]
    o = m @ params["w3"] + params["b3"]
    return jax.nn.softmax(o, axis=-1)


# ----------------------------------------------------------------------------
# Main
# ----------------------------------------------------------------------------
if __name__ == "__main__":
    # small shapes consistent with the module
    B, N, C = 2, 16, 4                    # batch, max tree nodes, max children
    VOCAB, F, CF, HID = 20, 32, 64, 128   # vocab, feature, conv_feature, hidden

    key = jax.random.PRNGKey(0)
    ks = jax.random.split(key, 16)

    emb = jax.random.normal(ks[0], (VOCAB + 1, F), jnp.float32) * 0.1
    emb = emb.at[0].set(0.0)              # nn.Embedding(padding_idx=0)

    w_t = jax.random.normal(ks[1], (F, CF), jnp.float32) / jnp.sqrt(F)
    w_l = jax.random.normal(ks[2], (F, CF), jnp.float32) / jnp.sqrt(F)
    w_r = jax.random.normal(ks[3], (F, CF), jnp.float32) / jnp.sqrt(F)
    b_conv = jax.random.normal(ks[4], (1, CF), jnp.float32) * 0.05

    w_hid = jax.random.normal(ks[5], (CF, HID), jnp.float32) / jnp.sqrt(CF)  # hidden2label
    b_hid = jax.random.normal(ks[6], (1, HID), jnp.float32) * 0.05

    w1 = jax.random.normal(ks[7], (HID, 64), jnp.float32) / jnp.sqrt(HID)    # hidden2labels
    b1 = jax.random.normal(ks[8], (1, 64), jnp.float32) * 0.05
    w2 = jax.random.normal(ks[9], (64, 32), jnp.float32) / jnp.sqrt(64.0)    # midllelayer
    b2 = jax.random.normal(ks[10], (1, 32), jnp.float32) * 0.05
    w3 = jax.random.normal(ks[11], (32, 5), jnp.float32) / jnp.sqrt(32.0)    # outputlayer2
    b3 = jax.random.normal(ks[12], (1, 5), jnp.float32) * 0.05

    params = dict(emb=emb, w_t=w_t, w_l=w_l, w_r=w_r, b_conv=b_conv,
                  w_hid=w_hid, b_hid=b_hid,
                  w1=w1, b1=b1, w2=w2, b2=b2, w3=w3, b3=b3)

    # inputs: node-type ids and per-node children indices (0 == no child)
    nodes1 = jax.random.randint(ks[13], (B, N), 0, VOCAB + 1, jnp.int32)
    nodes2 = jax.random.randint(ks[14], (B, N), 0, VOCAB + 1, jnp.int32)
    kc1, kc2 = jax.random.split(ks[15])
    children1 = jax.random.randint(kc1, (B, N, C), 0, N, jnp.int32)
    children2 = jax.random.randint(kc2, (B, N, C), 0, N, jnp.int32)

    y = tbcnn_classifier_forward(nodes1, children1, nodes2, children2, params)
    y = jax.block_until_ready(y)

    y_ref = ref_forward(nodes1, children1, nodes2, children2, params)
    assert y.shape == (B, 5)
    assert jnp.allclose(y, y_ref, atol=1e-4, rtol=1e-4), (y, y_ref)

    print("KERNEL_OK")
</pallas_src>

<mosaic_0001>
module attributes {stable_mosaic.version = 11 : i64} {
  func.func @tbcnn_fused_kernel(%arg0: memref<5x64x32xf32, #tpu.memory_space<vmem>>, %arg1: memref<64x5xi32, #tpu.memory_space<vmem>>, %arg2: memref<96x64xf32, #tpu.memory_space<vmem>>, %arg3: memref<1x64xf32, #tpu.memory_space<vmem>>, %arg4: memref<64x128xf32, #tpu.memory_space<vmem>>, %arg5: memref<1x128xf32, #tpu.memory_space<vmem>>, %arg6: memref<128x5xf32, #tpu.memory_space<vmem>>, %arg7: memref<1x5xf32, #tpu.memory_space<vmem>>, %arg8: memref<2x5xf32, #tpu.memory_space<vmem>>) attributes {dimension_semantics = [], scalar_prefetch = 0 : i64, scratch_operands = 0 : i64, tpu.core_type = #tpu.core_type<tc>} {
    %c0 = arith.constant 0 : index
    %c0_0 = arith.constant 0 : index
    %0 = vector.load %arg1[%c0, %c0_0] : memref<64x5xi32, #tpu.memory_space<vmem>>, vector<64x5xi32>
    %1 = tpu.iota {dimensions = array<i32: 1>} : vector<64x5xi32>
    %c0_i32 = arith.constant 0 : i32
    %2 = vector.broadcast %c0_i32 : i32 to vector<64x5xi32>
    %3 = arith.cmpi ne, %0, %2 : vector<64x5xi32>
    %4 = arith.extui %3 : vector<64x5xi1> to vector<64x5xi32>
    %5 = arith.sitofp %4 : vector<64x5xi32> to vector<64x5xf32>
    %6 = arith.extui %3 : vector<64x5xi1> to vector<64x5xi32>
    %cst = arith.constant dense<0> : vector<64xi32>
    %7 = vector.multi_reduction <add>, %6, %cst [1] : vector<64x5xi32> to vector<64xi32>
    %8 = vector.shape_cast %7 : vector<64xi32> to vector<64x1xi32>
    %9 = arith.sitofp %8 : vector<64x1xi32> to vector<64x1xf32>
    %c0_i32_1 = arith.constant 0 : i32
    %10 = vector.broadcast %c0_i32_1 : i32 to vector<64x5xi32>
    %11 = arith.cmpi eq, %1, %10 : vector<64x5xi32>
    %12 = arith.extui %11 : vector<64x5xi1> to vector<64x5xi32>
    %13 = arith.sitofp %12 : vector<64x5xi32> to vector<64x5xf32>
    %14 = arith.sitofp %1 : vector<64x5xi32> to vector<64x5xf32>
    %cst_2 = arith.constant 1.000000e+00 : f32
    %15 = vector.broadcast %cst_2 : f32 to vector<64x5xf32>
    %16 = arith.subf %14, %15 : vector<64x5xf32>
    %17 = arith.mulf %16, %5 : vector<64x5xf32>
    %c1_i32 = arith.constant 1 : i32
    %18 = vector.broadcast %c1_i32 : i32 to vector<64x5xi32>
    %19 = arith.cmpi eq, %1, %18 : vector<64x5xi32>
    %cst_3 = arith.constant 5.000000e-01 : f32
    %cst_4 = arith.constant 0.000000e+00 : f32
    %20 = vector.broadcast %cst_3 : f32 to vector<64x5xf32>
    %21 = vector.broadcast %cst_4 : f32 to vector<64x5xf32>
    %22 = arith.select %19, %20, %21 : vector<64x5xi1>, vector<64x5xf32>
    %cst_5 = arith.constant 1.000000e+00 : f32
    %23 = vector.broadcast %cst_5 : f32 to vector<64x1xf32>
    %24 = arith.subf %9, %23 : vector<64x1xf32>
    %cst_6 = arith.constant 1.000000e+00 : f32
    %25 = vector.broadcast %cst_6 : f32 to vector<64x1xf32>
    %26 = arith.maximumf %24, %25 : vector<64x1xf32>
    %c1_i32_7 = arith.constant 1 : i32
    %27 = vector.broadcast %c1_i32_7 : i32 to vector<64x1xi32>
    %28 = arith.cmpi eq, %8, %27 : vector<64x1xi32>
    %cst_8 = arith.constant 1.000000e+00 : f32
    %29 = vector.broadcast %cst_8 : f32 to vector<64x5xf32>
    %30 = arith.subf %29, %13 : vector<64x5xf32>
    %31 = arith.mulf %30, %17 : vector<64x5xf32>
    %32 = vector.broadcast %26 : vector<64x1xf32> to vector<64x5xf32>
    %33 = arith.divf %31, %32 : vector<64x5xf32>
    %34 = vector.shape_cast %28 : vector<64x1xi1> to vector<64x1xi1>
    %35 = vector.broadcast %34 : vector<64x1xi1> to vector<64x5xi1>
    %36 = arith.select %35, %22, %33 : vector<64x5xi1>, vector<64x5xf32>
    %cst_9 = arith.constant 1.000000e+00 : f32
    %37 = vector.broadcast %cst_9 : f32 to vector<64x5xf32>
    %38 = arith.subf %37, %13 : vector<64x5xf32>
    %cst_10 = arith.constant 1.000000e+00 : f32
    %39 = vector.broadcast %cst_10 : f32 to vector<64x5xf32>
    %40 = arith.subf %39, %36 : vector<64x5xf32>
    %41 = arith.mulf %38, %40 : vector<64x5xf32>
    %42 = arith.mulf %41, %5 : vector<64x5xf32>
    %c0_11 = arith.constant 0 : index
    %c0_12 = arith.constant 0 : index
    %c0_13 = arith.constant 0 : index
    %43 = vector.load %arg0[%c0_11, %c0_12, %c0_13] : memref<5x64x32xf32, #tpu.memory_space<vmem>>, vector<1x64x32xf32>
    %44 = vector.shape_cast %43 : vector<1x64x32xf32> to vector<64x32xf32>
    %cst_14 = arith.constant 0.000000e+00 : f32
    %45 = vector.broadcast %cst_14 : f32 to vector<64x32xf32>
    %cst_15 = arith.constant 0.000000e+00 : f32
    %46 = vector.broadcast %cst_15 : f32 to vector<64x32xf32>
    %c1 = arith.constant 1 : index
    %c0_16 = arith.constant 0 : index
    %c0_17 = arith.constant 0 : index
    %47 = vector.load %arg0[%c1, %c0_16, %c0_17] : memref<5x64x32xf32, #tpu.memory_space<vmem>>, vector<1x64x32xf32>
    %48 = vector.shape_cast %47 : vector<1x64x32xf32> to vector<64x32xf32>
    %49 = vector.extract_strided_slice %36 {offsets = [0, 1], sizes = [64, 1], strides = [1, 1]} : vector<64x5xf32> to vector<64x1xf32>
    %50 = vector.broadcast %49 : vector<64x1xf32> to vector<64x32xf32>
    %51 = arith.mulf %50, %48 : vector<64x32xf32>
    %52 = arith.addf %45, %51 : vector<64x32xf32>
    %53 = vector.extract_strided_slice %42 {offsets = [0, 1], sizes = [64, 1], strides = [1, 1]} : vector<64x5xf32> to vector<64x1xf32>
    %54 = vector.broadcast %53 : vector<64x1xf32> to vector<64x32xf32>
    %55 = arith.mulf %54, %48 : vector<64x32xf32>
    %56 = arith.addf %46, %55 : vector<64x32xf32>
    %c2 = arith.constant 2 : index
    %c0_18 = arith.constant 0 : index
    %c0_19 = arith.constant 0 : index
    %57 = vector.load %arg0[%c2, %c0_18, %c0_19] : memref<5x64x32xf32, #tpu.memory_space<vmem>>, vector<1x64x32xf32>
    %58 = vector.shape_cast %57 : vector<1x64x32xf32> to vector<64x32xf32>
    %59 = vector.extract_strided_slice %36 {offsets = [0, 2], sizes = [64, 1], strides = [1, 1]} : vector<64x5xf32> to vector<64x1xf32>
    %60 = vector.broadcast %59 : vector<64x1xf32> to vector<64x32xf32>
    %61 = arith.mulf %60, %58 : vector<64x32xf32>
    %62 = arith.addf %52, %61 : vector<64x32xf32>
    %63 = vector.extract_strided_slice %42 {offsets = [0, 2], sizes = [64, 1], strides = [1, 1]} : vector<64x5xf32> to vector<64x1xf32>
    %64 = vector.broadcast %63 : vector<64x1xf32> to vector<64x32xf32>
    %65 = arith.mulf %64, %58 : vector<64x32xf32>
    %66 = arith.addf %56, %65 : vector<64x32xf32>
    %c3 = arith.constant 3 : index
    %c0_20 = arith.constant 0 : index
    %c0_21 = arith.constant 0 : index
    %67 = vector.load %arg0[%c3, %c0_20, %c0_21] : memref<5x64x32xf32, #tpu.memory_space<vmem>>, vector<1x64x32xf32>
    %68 = vector.shape_cast %67 : vector<1x64x32xf32> to vector<64x32xf32>
    %69 = vector.extract_strided_slice %36 {offsets = [0, 3], sizes = [64, 1], strides = [1, 1]} : vector<64x5xf32> to vector<64x1xf32>
    %70 = vector.broadcast %69 : vector<64x1xf32> to vector<64x32xf32>
    %71 = arith.mulf %70, %68 : vector<64x32xf32>
    %72 = arith.addf %62, %71 : vector<64x32xf32>
    %73 = vector.extract_strided_slice %42 {offsets = [0, 3], sizes = [64, 1], strides = [1, 1]} : vector<64x5xf32> to vector<64x1xf32>
    %74 = vector.broadcast %73 : vector<64x1xf32> to vector<64x32xf32>
    %75 = arith.mulf %74, %68 : vector<64x32xf32>
    %76 = arith.addf %66, %75 : vector<64x32xf32>
    %c4 = arith.constant 4 : index
    %c0_22 = arith.constant 0 : index
    %c0_23 = arith.constant 0 : index
    %77 = vector.load %arg0[%c4, %c0_22, %c0_23] : memref<5x64x32xf32, #tpu.memory_space<vmem>>, vector<1x64x32xf32>
    %78 = vector.shape_cast %77 : vector<1x64x32xf32> to vector<64x32xf32>
    %79 = vector.extract_strided_slice %36 {offsets = [0, 4], sizes = [64, 1], strides = [1, 1]} : vector<64x5xf32> to vector<64x1xf32>
    %80 = vector.broadcast %79 : vector<64x1xf32> to vector<64x32xf32>
    %81 = arith.mulf %80, %78 : vector<64x32xf32>
    %82 = arith.addf %72, %81 : vector<64x32xf32>
    %83 = vector.extract_strided_slice %42 {offsets = [0, 4], sizes = [64, 1], strides = [1, 1]} : vector<64x5xf32> to vector<64x1xf32>
    %84 = vector.broadcast %83 : vector<64x1xf32> to vector<64x32xf32>
    %85 = arith.mulf %84, %78 : vector<64x32xf32>
    %86 = arith.addf %76, %85 : vector<64x32xf32>
    %87 = tpu.concatenate %44, %82, %86 in 1 : vector<64x32xf32>, vector<64x32xf32>, vector<64x32xf32> -> vector<64x96xf32>
    %c0_24 = arith.constant 0 : index
    %c0_25 = arith.constant 0 : index
    %88 = vector.load %arg2[%c0_24, %c0_25] : memref<96x64xf32, #tpu.memory_space<vmem>>, vector<96x64xf32>
    %cst_26 = arith.constant dense<0.000000e+00> : vector<64x64xf32>
    %89 = tpu.matmul %87, %88, %cst_26 {dimension_numbers = #tpu.dot_dimension_numbers<[1], [0], [0], [1], [0, 0, 1, 1], [], []>} : vector<64x96xf32>, vector<96x64xf32>, vector<64x64xf32> -> vector<64x64xf32>
    %c0_27 = arith.constant 0 : index
    %c0_28 = arith.constant 0 : index
    %90 = vector.load %arg3[%c0_27, %c0_28] : memref<1x64xf32, #tpu.memory_space<vmem>>, vector<1x64xf32>
    %91 = vector.broadcast %90 : vector<1x64xf32> to vector<64x64xf32>
    %92 = arith.addf %89, %91 : vector<64x64xf32>
    %93 = math.tanh %92 : vector<64x64xf32>
    %94 = vector.extract_strided_slice %93 {offsets = [0, 0], sizes = [16, 64], strides = [1, 1]} : vector<64x64xf32> to vector<16x64xf32>
    %cst_29 = arith.constant dense<0xFF800000> : vector<64xf32>
    %95 = vector.multi_reduction <maximumf>, %94, %cst_29 [0] : vector<16x64xf32> to vector<64xf32>
    %96 = vector.shape_cast %95 : vector<64xf32> to vector<1x64xf32>
    %97 = vector.extract_strided_slice %93 {offsets = [16, 0], sizes = [16, 64], strides = [1, 1]} : vector<64x64xf32> to vector<16x64xf32>
    %cst_30 = arith.constant dense<0xFF800000> : vector<64xf32>
    %98 = vector.multi_reduction <maximumf>, %97, %cst_30 [0] : vector<16x64xf32> to vector<64xf32>
    %99 = vector.shape_cast %98 : vector<64xf32> to vector<1x64xf32>
    %100 = vector.extract_strided_slice %93 {offsets = [32, 0], sizes = [16, 64], strides = [1, 1]} : vector<64x64xf32> to vector<16x64xf32>
    %cst_31 = arith.constant dense<0xFF800000> : vector<64xf32>
    %101 = vector.multi_reduction <maximumf>, %100, %cst_31 [0] : vector<16x64xf32> to vector<64xf32>
    %102 = vector.shape_cast %101 : vector<64xf32> to vector<1x64xf32>
    %103 = vector.extract_strided_slice %93 {offsets = [48, 0], sizes = [16, 64], strides = [1, 1]} : vector<64x64xf32> to vector<16x64xf32>
    %cst_32 = arith.constant dense<0xFF800000> : vector<64xf32>
    %104 = vector.multi_reduction <maximumf>, %103, %cst_32 [0] : vector<16x64xf32> to vector<64xf32>
    %105 = vector.shape_cast %104 : vector<64xf32> to vector<1x64xf32>
    %106 = tpu.concatenate %96, %99, %102, %105 in 0 : vector<1x64xf32>, vector<1x64xf32>, vector<1x64xf32>, vector<1x64xf32> -> vector<4x64xf32>
    %c0_33 = arith.constant 0 : index
    %c0_34 = arith.constant 0 : index
    %107 = vector.load %arg4[%c0_33, %c0_34] : memref<64x128xf32, #tpu.memory_space<vmem>>, vector<64x128xf32>
    %cst_35 = arith.constant dense<0.000000e+00> : vector<4x128xf32>
    %108 = tpu.matmul %106, %107, %cst_35 {dimension_numbers = #tpu.dot_dimension_numbers<[1], [0], [0], [1], [0, 0, 1, 1], [], []>} : vector<4x64xf32>, vector<64x128xf32>, vector<4x128xf32> -> vector<4x128xf32>
    %c0_36 = arith.constant 0 : index
    %c0_37 = arith.constant 0 : index
    %109 = vector.load %arg5[%c0_36, %c0_37] : memref<1x128xf32, #tpu.memory_space<vmem>>, vector<1x128xf32>
    %110 = vector.broadcast %109 : vector<1x128xf32> to vector<4x128xf32>
    %111 = arith.addf %108, %110 : vector<4x128xf32>
    %112 = vector.extract_strided_slice %111 {offsets = [0, 0], sizes = [2, 128], strides = [1, 1]} : vector<4x128xf32> to vector<2x128xf32>
    %113 = vector.extract_strided_slice %111 {offsets = [2, 0], sizes = [2, 128], strides = [1, 1]} : vector<4x128xf32> to vector<2x128xf32>
    %114 = arith.subf %112, %113 : vector<2x128xf32>
    %115 = math.absf %114 : vector<2x128xf32>
    %c0_38 = arith.constant 0 : index
    %c0_39 = arith.constant 0 : index
    %116 = vector.load %arg6[%c0_38, %c0_39] : memref<128x5xf32, #tpu.memory_space<vmem>>, vector<128x5xf32>
    %cst_40 = arith.constant dense<0.000000e+00> : vector<2x5xf32>
    %117 = tpu.matmul %115, %116, %cst_40 {dimension_numbers = #tpu.dot_dimension_numbers<[1], [0], [0], [1], [0, 0, 1, 1], [], []>} : vector<2x128xf32>, vector<128x5xf32>, vector<2x5xf32> -> vector<2x5xf32>
    %c0_41 = arith.constant 0 : index
    %c0_42 = arith.constant 0 : index
    %118 = vector.load %arg7[%c0_41, %c0_42] : memref<1x5xf32, #tpu.memory_space<vmem>>, vector<1x5xf32>
    %119 = vector.broadcast %118 : vector<1x5xf32> to vector<2x5xf32>
    %120 = arith.addf %117, %119 : vector<2x5xf32>
    %cst_43 = arith.constant dense<0xFF800000> : vector<2xf32>
    %121 = vector.multi_reduction <maximumf>, %120, %cst_43 [1] : vector<2x5xf32> to vector<2xf32>
    %122 = vector.shape_cast %121 : vector<2xf32> to vector<2x1xf32>
    %123 = vector.broadcast %122 : vector<2x1xf32> to vector<2x5xf32>
    %124 = arith.subf %120, %123 : vector<2x5xf32>
    %125 = math.exp %124 : vector<2x5xf32>
    %cst_44 = arith.constant dense<0.000000e+00> : vector<2xf32>
    %126 = vector.multi_reduction <add>, %125, %cst_44 [1] : vector<2x5xf32> to vector<2xf32>
    %127 = vector.shape_cast %126 : vector<2xf32> to vector<2x1xf32>
    %128 = vector.broadcast %127 : vector<2x1xf32> to vector<2x5xf32>
    %129 = arith.divf %125, %128 : vector<2x5xf32>
    %c0_45 = arith.constant 0 : index
    %c0_46 = arith.constant 0 : index
    %130 = vector.load %arg8[%c0_45, %c0_46] : memref<2x5xf32, #tpu.memory_space<vmem>>, vector<2x5xf32>
    tpu.vector_store %arg8[%c0_45, %c0_46], %129 {strides = array<i32>} : memref<2x5xf32, #tpu.memory_space<vmem>>, vector<2x5xf32>,
    return
  }
}

</mosaic_0001>

<bundles_post_ra>
// kernel: tbcnn_classifier_forward.1
= control target key start
LH: loop header
LB: loop body
LE: loop exit
PB: predicated region body
PF: predicated region fallthrough
CT: control target
= control target key end

     0   :  { %vm64_vm0 = vcmask 39936   ;;  %v38_v3 = vlaneseq  ;;  %v1374_v4 = vmov 0   ;;  %s2225_s0 = inlined_call_operand.vmem [shape: f32[5,64,32], index: 0, kind: input, shape index: {}]   ;;  %s2226_s1 = inlined_call_operand.vmem [shape: s32[64,5], index: 1, kind: input, shape index: {}]   ;;  %s2227_s2 = inlined_call_operand.vmem [shape: f32[96,64], index: 2, kind: input, shape index: {}]   ;;  %s2228_s3 = inlined_call_operand.vmem [shape: f32[1,64], index: 3, kind: input, shape index: {}]   ;;  %s2229_s4 = inlined_call_operand.vmem [shape: f32[64,128], index: 4, kind: input, shape index: {}]   ;;  %s2230_s5 = inlined_call_operand.vmem [shape: f32[1,128], index: 5, kind: input, shape index: {}]   ;;  %s2231_s6 = inlined_call_operand.vmem [shape: f32[128,5], index: 6, kind: input, shape index: {}]   ;;  %s2232_s7 = inlined_call_operand.vmem [shape: f32[1,5], index: 7, kind: input, shape index: {}]   ;;  %s2233_s8 = inlined_call_operand.hbm [shape: f32[2,5], index: 8, kind: output, shape index: {}]  }
   0x1   :  { %v1431_v0 = vld [vmem:[%s2226_s1 + $0x30] sm:$0xff]  ;;  %v1436_v1 = vld [vmem:[%s2226_s1 + $0x28] sm:$0xff]  ;;  %v1441_v2 = vld [vmem:[%s2226_s1] sm:$0xff] }
   0x2   :  { %vm46_vm1 = vcmp.ne.s32.totalorder %v1431_v0, 0  ;;  %vm45_vm2 = vcmp.ne.s32.totalorder %v1436_v1, 0  ;;  %vm40_vm3 = vcmp.ne.s32.totalorder %v1441_v2, 0  ;;  %v1461_v13 = vld [vmem:[%s2226_s1 + $0x8] sm:$0xff]  ;;  %v1463_v14 = vand.u32 127, %v38_v3 }
   0x3   :  { %v54_v5 = vsel %vm46_vm1, 1, %v1374_v4  ;;  %v53_v6 = vsel %vm45_vm2, 1, %v1374_v4  ;;  %v48_v9 = vsel %vm40_vm3, 1, %v1374_v4 }
   0x4   :  { %v143_v7 = vsel %vm64_vm0, %v54_v5, 0  ;;  %v130_v8 = vsel %vm64_vm0, %v53_v6, 0  ;;  %v65_v12 = vsel %vm64_vm0, %v48_v9, 0 }
   0x5   :  { %v145_v10 = vshrl.u32 %v143_v7, 16  ;;  %v132_v11 = vshrl.u32 %v130_v8, 16 }
   0x7   :  { %v147_v15 = vcvt.s32.f32 %v145_v10  ;;  %v134_v16 = vcvt.s32.f32 %v132_v11 }
   0x8   :  { %13 = vsyncpa [#allocation3], 0  ;;  %v67_v17 = vshrl.u32 %v65_v12, 16  ;;  %v144_v18 = vand.u32 65535, %v143_v7  ;;  %v131_v19 = vand.u32 65535, %v130_v8  ;;  %vm41_vm4 = vcmp.ne.s32.totalorder %v1461_v13, 0 }
   0x9   :  { %150 = vadd.xlane.f32.xlu2 %v147_v15  ;;  %137 = vadd.xlane.f32.xlu0 %v134_v16  ;;  %v1469_v20 = vld [vmem:[%s2226_s1 + $0x18] sm:$0xff]  ;;  %v180_v22 = vcvt.s32.f32 %v1463_v14  ;;  %v49_v23 = vsel %vm41_vm4, 1, %v1374_v4  ;;  %v66_v24 = vand.u32 65535, %v65_v12  ;;  %v1375_v32 = vmov 0.0   ;;  %v1497_v42 = vld [vmem:[%s2226_s1 + $0x10] sm:$0xff]  ;;  %v1504_v45 = vld [vmem:[%s2226_s1 + $0x20] sm:$0xff] }
   0xa   :  { %v69_v21 = vcvt.s32.f32 %v67_v17  ;;  %vm43_vm5 = vcmp.ne.s32.totalorder %v1469_v20, 0  ;;  %v37_v25 = vld [vmem:[%s2226_s1 + $0x38] sm:$0xff]  ;;  %v146_v26 = vcvt.s32.f32 %v144_v18  ;;  %v133_v27 = vcvt.s32.f32 %v131_v19  ;;  %s1380_s23 = smov 32   ;;  %s1381_s30 = smov 64  }
   0xb   :  { %v78_v28 = vsel %vm64_vm0, %v49_v23, 0  ;;  %v51_v29 = vsel %vm43_vm5, 1, %v1374_v4  ;;  %v1483_v30 = vadd.f32 -1.0, %v180_v22  ;;  %vm47_vm6 = vcmp.ne.s32.totalorder %v37_v25, 0  ;;  %s1164_s16 = sshll.u32 %s2233_s8, 4  ;;  %s1165_s16 = int_to_ptr.hbm [resolvable:$true] %s1164_s16 }
   0xc   :  { %72 = vadd.xlane.f32.xlu1 %v69_v21  ;;  %v68_v31 = vcvt.s32.f32 %v66_v24  ;;  %v1486_v33 = vsel %vm47_vm6, 1.0, %v1375_v32  ;;  %v80_v34 = vshrl.u32 %v78_v28, 16  ;;  %v79_v35 = vand.u32 65535, %v78_v28 }
   0xd   :  { %v104_v36 = vsel %vm64_vm0, %v51_v29, 0  ;;  %v1491_v37 = vmul.f32 %v1483_v30, %v1486_v33  ;;  %v55_v41 = vsel %vm47_vm6, 1, %v1374_v4  ;;  %vm42_vm7 = vcmp.ne.s32.totalorder %v1497_v42, 0 }
   0xe   :  { %v106_v38 = vshrl.u32 %v104_v36, 16  ;;  %v82_v39 = vcvt.s32.f32 %v80_v34  ;;  %v81_v40 = vcvt.s32.f32 %v79_v35  ;;  %v156_v44 = vsel %vm64_vm0, %v55_v41, 0 }
   0xf   :  { %v105_v46 = vand.u32 65535, %v104_v36  ;;  %v157_v47 = vand.u32 65535, %v156_v44  ;;  %v50_v48 = vsel %vm42_vm7, 1, %v1374_v4  ;;  %vm44_vm8 = vcmp.ne.s32.totalorder %v1504_v45, 0 }
  0x10   :  { %v108_v43 = vcvt.s32.f32 %v106_v38  ;;  %v158_v49 = vshrl.u32 %v156_v44, 16  ;;  %v91_v52 = vsel %vm64_vm0, %v50_v48, 0  ;;  %v52_v53 = vsel %vm44_vm8, 1, %v1374_v4 }
  0x11   :  { %148 = vadd.xlane.f32.xlu2 %v146_v26  ;;  %135 = vadd.xlane.f32.xlu0 %v133_v27  ;;  %v107_v50 = vcvt.s32.f32 %v105_v46  ;;  %v159_v51 = vcvt.s32.f32 %v157_v47  ;;  %v93_v55 = vshrl.u32 %v91_v52, 16  ;;  %v92_v56 = vand.u32 65535, %v91_v52 }
  0x12   :  { %v160_v54 = vcvt.s32.f32 %v158_v49  ;;  %v117_v57 = vsel %vm64_vm0, %v52_v53, 0  ;;  %v1376_v17 = vmov 3   ;;  %v1377_v18 = vmov 2  }
  0x13   :  { %v119_v58 = vshrl.u32 %v117_v57, 16  ;;  %v95_v59 = vcvt.s32.f32 %v93_v55  ;;  %v94_v60 = vcvt.s32.f32 %v92_v56  ;;  %v118_v62 = vand.u32 65535, %v117_v57  ;;  %1270 = vset.pattern.permute.xlu0 %v1376_v17  ;;  %1266 = vset.pattern.permute.xlu2 %v1377_v18 }
  0x14   :  { %70 = vadd.xlane.f32.xlu1 %v68_v31  ;;  %v1378_v21 = vmov 1   ;;  %vm177_vm9 = vcmp.eq.s32.totalorder %v1463_v14, 0  ;;  %v1539_v47 = vsel %vm40_vm3, 1.0, %v1375_v32  ;;  %v1553_v2 = vsel %vm41_vm4, 1.0, %v1375_v32 }
  0x15   :  { %v121_v61 = vcvt.s32.f32 %v119_v58  ;;  %v120_v63 = vcvt.s32.f32 %v118_v62  ;;  %1265 = vset.pattern.permute.xlu1 %v1378_v21  ;;  %v1181_v46 = vsel %vm177_vm9, 1.0, %v1375_v32  ;;  %vm190_vm10 = vcmp.eq.s32.totalorder %v1463_v14, 1 }
  0x16   :  { %v1544_v1 = vsub.f32 1.0, %v1181_v46 }
  0x19   :  { %85 = vadd.xlane.f32.xlu0 %v82_v39  ;;  %83 = vadd.xlane.f32.xlu2 %v81_v40 }
  0x1c   :  { %111 = vadd.xlane.f32.xlu1 %v108_v43  ;;  %v1533_v43 = vsel %vm45_vm2, 1.0, %v1375_v32 }
  0x1d   :  { %v187_v53 = vmul.f32 %v1483_v30, %v1533_v43 }
  0x21   :  { %109 = vadd.xlane.f32.xlu0 %v107_v50  ;;  %161 = vadd.xlane.f32.xlu2 %v159_v51 }
  0x24   :  { %163 = vadd.xlane.f32.xlu1 %v160_v54  ;;  %v182_v54 = vmul.f32 %v1483_v30, %v1539_v47 }
  0x26   :  { %v217_v13 = vmul.f32 %v1544_v1, %v182_v54 }
  0x29   :  { %98 = vadd.xlane.f32.xlu0 %v95_v59  ;;  %96 = vadd.xlane.f32.xlu2 %v94_v60  ;;  %v1561_v59 = vsel %vm46_vm1, 1.0, %v1375_v32 }
  0x2c   :  { %124 = vadd.xlane.f32.xlu1 %v121_v61 }
  0x31   :  { %122 = vadd.xlane.f32.xlu0 %v120_v63  ;;  %v222_v63 = vmul.f32 %v1544_v1, %v187_v53 }
  0x7c   :  { %v151_v3 = vpop.xlane.xlu2 %150  ;;  %v138_v4 = vpop.xlane.xlu0 %137 }
  0x7d   :  { %v153_v5 = vcvt.f32.s32 %v151_v3  ;;  %v140_v7 = vcvt.f32.s32 %v138_v4  ;;  %v183_v3 = vmul.f32 %v1483_v30, %v1553_v2 }
  0x7f   :  { %v73_v6 = vpop.xlane.xlu1 %72  ;;  %v154_v9 = vshll.u32 %v153_v5, 16  ;;  %v141_v12 = vshll.u32 %v140_v7, 16  ;;  %v1572_v5 = vsel %vm43_vm5, 1.0, %v1375_v32 }
  0x80   :  { %v75_v8 = vcvt.f32.s32 %v73_v6 }
  0x82   :  { %v76_v19 = vshll.u32 %v75_v8, 16 }
  0x84   :  { %v149_v10 = vpop.xlane.xlu2 %148  ;;  %v136_v11 = vpop.xlane.xlu0 %135 }
  0x85   :  { %v152_v15 = vcvt.f32.s32 %v149_v10  ;;  %v139_v16 = vcvt.f32.s32 %v136_v11 }
  0x87   :  { %v1518_v22 = vadd.s32 %v154_v9, %v152_v15  ;;  %v1520_v23 = vadd.s32 %v141_v12, %v139_v16  ;;  %v71_v24 = vpop.xlane.xlu1 %70 }
  0x88   :  { %v74_v25 = vcvt.f32.s32 %v71_v24 }
  0x89   :  { %v175_v26 = vcvt.s32.f32 %v1518_v22  ;;  %v174_v27 = vcvt.s32.f32 %v1520_v23  ;;  %vm213_vm14 = vcmp.eq.s32.totalorder %v1520_v23, 1 }
  0x8a   :  { %v1524_v28 = vadd.s32 %v76_v19, %v74_v25 }
  0x8b   :  { %v1189_v29 = vadd.f32 -1.0, %v175_v26  ;;  %v1188_v31 = vadd.f32 -1.0, %v174_v27  ;;  %v1585_v27 = vsel %vm190_vm10, 0.5, %v1375_v32 }
  0x8c   :  { %v169_v34 = vcvt.s32.f32 %v1524_v28  ;;  %v86_v35 = vpop.xlane.xlu0 %85  ;;  %v84_v36 = vpop.xlane.xlu2 %83  ;;  %vm208_vm10 = vcmp.eq.s32.totalorder %v1524_v28, 1  ;;  %v1379_v28 = vmov 4  }
  0x8d   :  { %v1528_v38 = vmax.f32 %v1189_v29, 1.0  ;;  %v205_v39 = vmax.f32 %v1188_v31, 1.0  ;;  %v88_v40 = vcvt.f32.s32 %v86_v35  ;;  %v87_v41 = vcvt.f32.s32 %v84_v36 }
  0x8e   :  { %v1183_v44 = vadd.f32 -1.0, %v169_v34 }
  0x8f   :  { %1312 = vrcp.f32 %v1528_v38  ;;  %v89_v48 = vshll.u32 %v88_v40, 16  ;;  %v112_v49 = vpop.xlane.xlu1 %111  ;;  %v309_v9 = vand.u32 2147483647, %v205_v39  ;;  %v311_v10 = vand.u32 2147483648, %v205_v39 }
  0x90   :  { %1314 = vrcp.f32 %v205_v39  ;;  %v200_v50 = vmax.f32 %v1183_v44, 1.0  ;;  %v114_v51 = vcvt.f32.s32 %v112_v49  ;;  %vm305_vm15 = vweird.f32 %v205_v39 }
  0x91   :  { %v1542_v52 = vadd.s32 %v89_v48, %v87_v41  ;;  %vm1587_vm0 = vcmp.eq.f32.partialorder %v309_v9, 8.507059e+37  ;;  %vm320_vm2 = vweird.f32 %v1528_v38  ;;  %v312_v36 = vor.u32 1.1754944e-38, %v311_v10 }
  0x92   :  { %1316 = vrcp.f32 %v200_v50  ;;  %v115_v56 = vshll.u32 %v114_v51, 16  ;;  %vm230_vm11 = vweird.f32 %v200_v50  ;;  %v234_v16 = vand.u32 2147483647, %v200_v50 }
  0x93   :  { %v170_v55 = vcvt.s32.f32 %v1542_v52  ;;  %v236_v19 = vand.u32 2147483648, %v200_v50  ;;  %v324_v41 = vand.u32 2147483647, %v1528_v38  ;;  %v326_v53 = vand.u32 2147483648, %v1528_v38 }
  0x94   :  { %v110_v57 = vpop.xlane.xlu0 %109  ;;  %vm1599_vm4 = vcmp.eq.f32.partialorder %v234_v16, 8.507059e+37  ;;  %v185_v10 = vmul.f32 %v1483_v30, %v1572_v5 }
  0x95   :  { %v1556_v58 = vpop.eup %1312  ;;  %v1184_v60 = vadd.f32 -1.0, %v170_v55  ;;  %v113_v61 = vcvt.f32.s32 %v110_v57 }
  0x96   :  { %v1315_v62 = vpop.eup %1314  ;;  %v316_v4 = vmul.f32 %v1556_v58, %v1528_v38  ;;  %vm321_vm5 = vweird.f32 %v1556_v58 }
  0x97   :  { %v301_v0 = vmul.f32 %v1315_v62, %v205_v39  ;;  %v1574_v6 = vmax.f32 %v1184_v60, 1.0  ;;  %v1576_v7 = vadd.s32 %v115_v56, %v113_v61  ;;  %vm306_vm12 = vweird.f32 %v1315_v62 }
  0x98   :  { %v1317_v8 = vpop.eup %1316  ;;  %v317_v20 = vsub.f32 1.0, %v316_v4  ;;  %vm307_vm1 = vmor %vm305_vm15, %vm306_vm12  ;;  %v237_v39 = vor.u32 1.1754944e-38, %v236_v19 }
  0x99   :  { %v302_v11 = vsub.f32 1.0, %v301_v0  ;;  %v226_v12 = vmul.f32 %v1317_v8, %v200_v50  ;;  %1318 = vrcp.f32 %v1574_v6  ;;  %v172_v15 = vcvt.s32.f32 %v1576_v7 }
  0x9a   :  { %vm231_vm13 = vweird.f32 %v1317_v8  ;;  %v318_v49 = vmul.f32 %v1556_v58, %v317_v20  ;;  %vm245_vm6 = vweird.f32 %v1574_v6  ;;  %v251_v56 = vand.u32 2147483648, %v1574_v6 }
  0x9b   :  { %v227_v24 = vsub.f32 1.0, %v226_v12  ;;  %v1186_v25 = vadd.f32 -1.0, %v172_v15  ;;  %v303_v26 = vmul.f32 %v1315_v62, %v302_v11  ;;  %vm1595_vm3 = vmor %vm230_vm11, %vm231_vm13  ;;  %v249_v61 = vand.u32 2147483647, %v1574_v6 }
  0x9c   :  { %v319_v4 = vadd.f32 %v1556_v58, %v318_v49  ;;  %v188_v0 = vmul.f32 %v1483_v30, %v1561_v59  ;;  %vm1634_vm11 = vmor %vm320_vm2, %vm321_vm5  ;;  %v252_v11 = vor.u32 1.1754944e-38, %v251_v56  ;;  %vm1650_vm13 = vcmp.eq.f32.partialorder %v324_v41, 8.507059e+37  ;;  %v99_v56 = vpop.xlane.xlu0 %98 }
  0x9d   :  { %v1591_v31 = vmax.f32 %v1186_v25, 1.0  ;;  %v304_v34 = vadd.f32 %v1315_v62, %v303_v26  ;;  %v228_v35 = vmul.f32 %v1317_v8, %v227_v24  ;;  %v327_v20 = vor.u32 1.1754944e-38, %v326_v53  ;;  %v164_v24 = vpop.xlane.xlu1 %163 }
  0x9e   :  { %v166_v29 = vcvt.f32.s32 %v164_v24  ;;  %v220_v41 = vmul.f32 %v1544_v1, %v185_v10  ;;  %vm214_vm5 = vcmp.eq.s32.totalorder %v1518_v22, 1 }
  0x9f   :  { %v1319_v44 = vpop.eup %1318  ;;  %1320 = vrcp.f32 %v1591_v31  ;;  %v308_v46 = vsel %vm307_vm1, %v1315_v62, %v304_v34  ;;  %v229_v48 = vadd.f32 %v1317_v8, %v228_v35  ;;  %vm275_vm15 = vweird.f32 %v1591_v31  ;;  %v162_v34 = vpop.xlane.xlu2 %161 }
  0xa0   :  { %v241_v50 = vmul.f32 %v1319_v44, %v1574_v6  ;;  %v313_v51 = vsel %vm1587_vm0, %v312_v36, %v308_v46  ;;  %vm246_vm9 = vweird.f32 %v1319_v44  ;;  %v323_v6 = vsel %vm1634_vm11, %v1556_v58, %v319_v4 }
  0xa1   :  { %v314_v54 = vmul.f32 %v313_v51, %v222_v63  ;;  %v233_v55 = vsel %vm1595_vm3, %v1317_v8, %v229_v48  ;;  %v218_v8 = vmul.f32 %v1544_v1, %v183_v3  ;;  %vm1646_vm12 = vmor %vm245_vm6, %vm246_vm9  ;;  %v279_v16 = vand.u32 2147483647, %v1591_v31 }
  0xa2   :  { %v242_v57 = vsub.f32 1.0, %v241_v50  ;;  %v238_v60 = vsel %vm1599_vm4, %v237_v39, %v233_v55  ;;  %v281_v19 = vand.u32 2147483648, %v1591_v31  ;;  %vm209_vm1 = vcmp.eq.s32.totalorder %v1542_v52, 1 }
  0xa3   :  { %v1621_v62 = vsel %vm213_vm14, %v1585_v27, %v314_v54  ;;  %v239_v63 = vmul.f32 %v238_v60, %v217_v13  ;;  %vm250_vm14 = vcmp.eq.f32.partialorder %v249_v61, 8.507059e+37  ;;  %v165_v36 = vcvt.f32.s32 %v162_v34 }
  0xa4   :  { %552 = vperm.xlu2 %1266, %v1621_v62   ;;  %437 = vperm.xlu1 %1265, %v1621_v62   ;;  %v243_v9 = vmul.f32 %v1319_v44, %v242_v57  ;;  %v167_v14 = vshll.u32 %v166_v29, 16  ;;  %v223_v39 = vmul.f32 %v1544_v1, %v188_v0  ;;  %v328_v46 = vsel %vm1650_vm13, %v327_v20, %v323_v6 }
  0xa5   :  { %v1321_v13 = vpop.eup %1320  ;;  %v1641_v3 = vsel %vm208_vm10, %v1585_v27, %v239_v63  ;;  %vm280_vm3 = vcmp.eq.f32.partialorder %v279_v16, 8.507059e+37  ;;  %vm211_vm4 = vcmp.eq.s32.totalorder %v1576_v7, 1  ;;  %v101_v61 = vcvt.f32.s32 %v99_v56 }
  0xa6   :  { %v271_v12 = vmul.f32 %v1321_v13, %v1591_v31  ;;  %637 = vperm.xlu0 %1270, %v1641_v3   ;;  %v244_v15 = vadd.f32 %v1319_v44, %v243_v9  ;;  %vm276_vm0 = vweird.f32 %v1321_v13  ;;  %v1676_v49 = vadd.s32 %v167_v14, %v165_v36  ;;  %v125_v14 = vpop.xlane.xlu1 %124 }
  0xa7   :  { %vm277_vm2 = vmor %vm275_vm15, %vm276_vm0  ;;  %v329_v51 = vmul.f32 %v328_v46, %v223_v39  ;;  %v97_v4 = vpop.xlane.xlu2 %96  ;;  %v374_v0 = vsub.f32 1.0, %v1621_v62  ;;  %v102_v22 = vshll.u32 %v101_v61, 16  ;;  %v369_v10 = vsub.f32 1.0, %v1641_v3 }
  0xa8   :  { %v272_v25 = vsub.f32 1.0, %v271_v12  ;;  %v248_v26 = vsel %vm1646_vm12, %v1319_v44, %v244_v15  ;;  %v282_v44 = vor.u32 1.1754944e-38, %v281_v19  ;;  %v176_v31 = vcvt.s32.f32 %v1676_v49 }
  0xa9   :  { %v253_v35 = vsel %vm250_vm14, %v252_v11, %v248_v26  ;;  %v1685_v60 = vsel %vm214_vm5, %v1585_v27, %v329_v51  ;;  %v100_v7 = vcvt.f32.s32 %v97_v4  ;;  %v377_v12 = vmul.f32 %v369_v10, %v1544_v1 }
  0xaa   :  { %v254_v40 = vmul.f32 %v253_v35, %v218_v8  ;;  %v273_v58 = vmul.f32 %v1321_v13, %v272_v25  ;;  %v1190_v55 = vadd.f32 -1.0, %v176_v31  ;;  %v382_v8 = vmul.f32 %v374_v0, %v1544_v1 }
  0xab   :  { %v1696_v23 = vadd.s32 %v102_v22, %v100_v7  ;;  %v375_v6 = vsub.f32 1.0, %v1685_v60  ;;  %v224_v36 = vmul.f32 %v1544_v1, %v1491_v37  ;;  %vm215_vm12 = vcmp.eq.s32.totalorder %v1676_v49, 1  ;;  %v123_v37 = vpop.xlane.xlu0 %122 }
  0xac   :  { %1267 = vset.pattern.permute.xlu1 %v1376_v17  ;;  %532 = vperm.xlu2 %1266, %v1641_v3   ;;  %v1674_v52 = vsel %vm209_vm1, %v1585_v27, %v254_v40  ;;  %v274_v48 = vadd.f32 %v1321_v13, %v273_v58  ;;  %v207_v57 = vmax.f32 %v1190_v55, 1.0  ;;  %v126_v31 = vcvt.f32.s32 %v123_v37 }
  0xad   :  { %657 = vperm.xlu1 %1267, %v1621_v62   ;;  %v171_v38 = vcvt.s32.f32 %v1696_v23  ;;  %v383_v19 = vmul.f32 %v375_v6, %v1544_v1  ;;  %v370_v34 = vsub.f32 1.0, %v1674_v52  ;;  %v1752_v55 = vsel %vm42_vm7, 1.0, %v1375_v32 }
  0xae   :  { %1274 = vset.pattern.permute.xlu0 %v1378_v21  ;;  %v278_v50 = vsel %vm277_vm2, %v1321_v13, %v274_v48  ;;  %1322 = vrcp.f32 %v207_v57  ;;  %v1701_v13 = vmul.f32 %v1533_v43, %v382_v8  ;;  %v1711_v43 = vmul.f32 %v1539_v47, %v377_v12 }
  0xaf   :  { %417 = vperm.xlu0 %1274, %v1674_v52   ;;  %v283_v53 = vsel %vm280_vm3, %v282_v44, %v278_v50  ;;  %v1185_v20 = vadd.f32 -1.0, %v171_v38  ;;  %vm335_vm6 = vweird.f32 %v207_v57  ;;  %v341_v24 = vand.u32 2147483648, %v207_v57 }
  0xb0   :  { %v284_v54 = vmul.f32 %v283_v53, %v220_v41  ;;  %v339_v47 = vand.u32 2147483647, %v207_v57  ;;  %v1720_v26 = vmul.f32 %v1561_v59, %v383_v19  ;;  %v378_v59 = vmul.f32 %v370_v34, %v1544_v1  ;;  %v1196_v34 = vld [vmem:[%s2225_s0 + $0x68] sm:$0xff] }
  0xb1   :  { %v342_v29 = vor.u32 1.1754944e-38, %v341_v24  ;;  %v127_v44 = vcvt.f32.s32 %v125_v14  ;;  %vm210_vm0 = vcmp.eq.s32.totalorder %v1696_v23, 1  ;;  %v1212_v14 = vld [vmem:[%s2225_s0 + $0xe8] sm:$0xff]  ;;  %vm901_vm5 = vcmask 261120  }
  0xb2   :  { %v1689_v63 = vsel %vm211_vm4, %v1585_v27, %v284_v54  ;;  %vm340_vm11 = vcmp.eq.f32.partialorder %v339_v47, 8.507059e+37  ;;  %v1733_v46 = vmul.f32 %v1553_v2, %v378_v59 }
  0xb3   :  { %v128_v50 = vshll.u32 %v127_v44, 16  ;;  %v1836_v44 = vld [vmem:[%s2225_s0 + $0x48] sm:$0xff] }
  0xb4   :  { %556 = vperm.xlu2 %1266, %v1685_v60   ;;  %v1323_v9 = vpop.eup %1322 }
  0xb5   :  { %1268 = vset.pattern.permute.xlu1 %v1378_v21  ;;  %v331_v11 = vmul.f32 %v1323_v9, %v207_v57  ;;  %vm336_vm9 = vweird.f32 %v1323_v9  ;;  %v1747_v54 = vadd.s32 %v128_v50, %v126_v31 }
  0xb6   :  { %412 = vperm.xlu1 %1268, %v1641_v3   ;;  %vm337_vm10 = vmor %vm335_vm6, %vm336_vm9  ;;  %vm910_vm6 = vcmask 523264   ;;  %vm935_vm9 = vcmask 785408  }
  0xb7   :  { %427 = vperm.xlu0 %1274, %v1689_v63   ;;  %v332_v15 = vsub.f32 1.0, %v331_v11  ;;  %v173_v42 = vcvt.s32.f32 %v1747_v54  ;;  %vm212_vm4 = vcmp.eq.s32.totalorder %v1747_v54, 1 }
  0xb9   :  { %v333_v16 = vmul.f32 %v1323_v9, %v332_v15  ;;  %v1187_v22 = vadd.f32 -1.0, %v173_v42 }
  0xbb   :  { %v334_v25 = vadd.f32 %v1323_v9, %v333_v16  ;;  %v204_v8 = vmax.f32 %v1187_v22, 1.0 }
  0xbc   :  { %1273 = vset.pattern.permute.xlu2 %v1376_v17 }
  0xbd   :  { %661 = vperm.xlu2 %1273, %v1685_v60   ;;  %v338_v35 = vsel %vm337_vm10, %v1323_v9, %v334_v25  ;;  %vm290_vm1 = vweird.f32 %v204_v8  ;;  %v294_v16 = vand.u32 2147483647, %v204_v8  ;;  %vm1045_vm10 = vcmask 1040384  }
  0xbe   :  { %1269 = vset.pattern.permute.xlu1 %v1379_v28  ;;  %v343_v58 = vsel %vm340_vm11, %v342_v29, %v338_v35  ;;  %vm1047_vm11 = vcmask 1041408  }
  0xbf   :  { %493 = vperm.xlu0 %1274, %v1701_v13   ;;  %762 = vperm.xlu1 %1269, %v1621_v62   ;;  %v202_v62 = vmax.f32 %v1185_v20, 1.0  ;;  %v344_v41 = vmul.f32 %v343_v58, %v224_v36  ;;  %v296_v20 = vand.u32 2147483648, %v204_v8 }
  0xc1   :  { %1324 = vrcp.f32 %v202_v62  ;;  %v1739_v48 = vsel %vm215_vm12, %v1585_v27, %v344_v41  ;;  %vm260_vm13 = vweird.f32 %v202_v62  ;;  %v266_v56 = vand.u32 2147483648, %v202_v62 }
  0xc2   :  { %v376_v49 = vsub.f32 1.0, %v1739_v48  ;;  %1326 = vrcp.f32 %v204_v8  ;;  %v297_v45 = vor.u32 1.1754944e-38, %v296_v20  ;;  %vm1049_vm12 = vcmask 1042432  }
  0xc3   :  { %v267_v61 = vor.u32 1.1754944e-38, %v266_v56 }
  0xc4   :  { %v384_v2 = vmul.f32 %v376_v49, %v1544_v1 }
  0xc5   :  { %1275 = vset.pattern.permute.xlu2 %v1377_v18 }
  0xc6   :  { %536 = vperm.xlu2 %1275, %v1674_v52   ;;  %v1745_v53 = vmul.f32 %v1486_v33, %v384_v2  ;;  %v184_v33 = vmul.f32 %v1483_v30, %v1752_v55 }
  0xc7   :  { %468 = vperm.xlu0 %1274, %v1711_v43   ;;  %1271 = vset.pattern.permute.xlu1 %v1378_v21  ;;  %v1325_v40 = vpop.eup %1324 }
  0xc8   :  { %442 = vperm.xlu1 %1271, %v1685_v60   ;;  %v256_v39 = vmul.f32 %v1325_v40, %v202_v62  ;;  %vm261_vm14 = vweird.f32 %v1325_v40  ;;  %v219_v0 = vmul.f32 %v1544_v1, %v184_v33  ;;  %v1327_v11 = vpop.eup %1326 }
  0xc9   :  { %vm262_vm15 = vmor %vm260_vm13, %vm261_vm14  ;;  %v286_v38 = vmul.f32 %v1327_v11, %v204_v8  ;;  %vm291_vm2 = vweird.f32 %v1327_v11  ;;  %vm1131_vm13 = vcmask 33792  }
  0xca   :  { %vm292_vm3 = vmor %vm290_vm1, %vm291_vm2 }
  0xcb   :  { %v287_v23 = vsub.f32 1.0, %v286_v38 }
  0xcd   :  { %v288_v15 = vmul.f32 %v1327_v11, %v287_v23  ;;  %v1199_v23 = vld [vmem:[%s2225_s0 + $0x80] sm:$0xff] }
  0xce   :  { %600 = vperm.xlu2 %1275, %v1701_v13  }
  0xcf   :  { %498 = vperm.xlu0 %1274, %v1720_v26   ;;  %v289_v6 = vadd.f32 %v1327_v11, %v288_v15 }
  0xd0   :  { %1272 = vset.pattern.permute.xlu1 %v1379_v28 }
  0xd1   :  { %742 = vperm.xlu1 %1272, %v1641_v3   ;;  %v257_v3 = vsub.f32 1.0, %v256_v39  ;;  %v293_v19 = vsel %vm292_vm3, %v1327_v11, %v289_v6  ;;  %v1830_v39 = vld [vmem:[%s2225_s0 + $0x88] sm:$0xff]  ;;  %v1865_v11 = vld [vmem:[%s2225_s0 + $0xb0] sm:$0xff] }
  0xd3   :  { %v258_v51 = vmul.f32 %v1325_v40, %v257_v3 }
  0xd5   :  { %v259_v57 = vadd.f32 %v1325_v40, %v258_v51 }
  0xd6   :  { %1278 = vset.pattern.permute.xlu2 %v1376_v17 }
  0xd7   :  { %1285 = vset.pattern.permute.xlu0 %v1377_v18  ;;  %705 = vperm.xlu2 %1278, %v1701_v13   ;;  %v263_v4 = vsel %vm262_vm15, %v1325_v40, %v259_v57  ;;  %v1853_v57 = vld [vmem:[%s2225_s0 + $0x128] sm:$0xff] }
  0xd8   :  { %584 = vperm.xlu0 %1285, %v1733_v46  }
  0xd9   :  { %766 = vperm.xlu1 %1272, %v1685_v60   ;;  %v264_v60 = vand.u32 2147483647, %v202_v62 }
  0xdb   :  { %vm265_vm7 = vcmp.eq.f32.partialorder %v264_v60, 8.507059e+37 }
  0xdc   :  { %v268_v7 = vsel %vm265_vm7, %v267_v61, %v263_v4 }
  0xdd   :  { %v269_v9 = vmul.f32 %v268_v7, %v219_v0 }
  0xdf   :  { %1279 = vset.pattern.permute.xlu2 %v1377_v18  ;;  %v1771_v10 = vsel %vm210_vm0, %v1585_v27, %v269_v9 }
  0xe0   :  { %1286 = vset.pattern.permute.xlu0 %v1376_v17  ;;  %580 = vperm.xlu2 %1279, %v1711_v43  }
  0xe1   :  { %649 = vperm.xlu0 %1286, %v1689_v63   ;;  %1276 = vset.pattern.permute.xlu1 %v1377_v18 }
  0xe2   :  { %544 = vperm.xlu1 %1276, %v1689_v63  }
  0xe8   :  { %1281 = vset.pattern.permute.xlu2 %v1376_v17 }
  0xe9   :  { %665 = vperm.xlu0 %1286, %v1739_v48   ;;  %685 = vperm.xlu2 %1281, %v1711_v43  }
  0xea   :  { %1277 = vset.pattern.permute.xlu1 %v1376_v17 }
  0xeb   :  { %641 = vperm.xlu1 %1277, %v1674_v52  }
  0xf1   :  { %645 = vperm.xlu0 %1286, %v1771_v10   ;;  %1282 = vset.pattern.permute.xlu2 %v1377_v18 }
  0xf2   :  { %604 = vperm.xlu2 %1282, %v1720_v26  }
  0xf3   :  { %1280 = vset.pattern.permute.xlu1 %v1379_v28 }
  0xf4   :  { %810 = vperm.xlu1 %1280, %v1701_v13   ;;  %v1786_v13 = vsel %vm44_vm8, 1.0, %v1375_v32  ;;  %vm295_vm8 = vcmp.eq.f32.partialorder %v294_v16, 8.507059e+37 }
  0xf5   :  { %v298_v25 = vsel %vm295_vm8, %v297_v45, %v293_v19 }
  0xf9   :  { %1304 = vset.pattern.permute.xlu0 %v1379_v28 }
  0xfa   :  { %746 = vperm.xlu0 %1304, %v1674_v52   ;;  %1284 = vset.pattern.permute.xlu2 %v1378_v21  ;;  %v372_v52 = vsub.f32 1.0, %v1689_v63 }
  0xfb   :  { %473 = vperm.xlu2 %1284, %v1733_v46  }
  0xfc   :  { %790 = vperm.xlu1 %1280, %v1711_v43   ;;  %v186_v43 = vmul.f32 %v1483_v30, %v1786_v13  ;;  %v380_v62 = vmul.f32 %v372_v52, %v1544_v1 }
  0xfe   :  { %v553_v12 = vpop.permute.xlu2 %552  ;;  %v221_v24 = vmul.f32 %v1544_v1, %v186_v43  ;;  %v388_v47 = vmul.f32 %v1572_v5, %v380_v62  ;;  %v1204_v5 = vld [vmem:[%s2225_s0 + $0xa8] sm:$0xff] }
  0xff   :  { %v568_v36 = vmul.f32 %v1204_v5, %v553_v12  ;;  %v1882_v12 = vld [vmem:[%s2225_s0 + $0xf0] sm:$0xff] }
 0x100   :  { %v299_v30 = vmul.f32 %v298_v25, %v221_v24 }
 0x102   :  { %770 = vperm.xlu0 %1304, %v1739_v48   ;;  %v1809_v29 = vsel %vm212_vm4, %v1585_v27, %v299_v30 }
 0x103   :  { %1288 = vset.pattern.permute.xlu2 %v1379_v28 }
 0x104   :  { %814 = vperm.xlu2 %1288, %v1720_v26   ;;  %1283 = vset.pattern.permute.xlu1 %v1376_v17 }
 0x105   :  { %709 = vperm.xlu1 %1283, %v1720_v26  }
 0x106   :  { %v1796_v32 = vpop.permute.xlu2 %532 }
 0x107   :  { %v563_v25 = vmul.f32 %v1199_v23, %v1796_v32  ;;  %v371_v32 = vsub.f32 1.0, %v1771_v10 }
 0x10a   :  { %818 = vperm.xlu0 %1304, %v1745_v53  }
 0x10c   :  { %1289 = vset.pattern.permute.xlu2 %v1377_v18 }
 0x10d   :  { %1287 = vset.pattern.permute.xlu1 %v1378_v21  ;;  %592 = vperm.xlu2 %1289, %v388_v47  }
 0x10e   :  { %v1805_v26 = vpop.permute.xlu2 %556  ;;  %447 = vperm.xlu1 %1287, %v1739_v48  }
 0x10f   :  { %v569_v52 = vmul.f32 %v1865_v11, %v1805_v26  ;;  %v1215_v26 = vld [vmem:[%s2225_s0 + $0x100] sm:$0xff] }
 0x112   :  { %758 = vperm.xlu0 %1304, %v1809_v29  }
 0x115   :  { %1290 = vset.pattern.permute.xlu2 %v1376_v17 }
 0x116   :  { %689 = vperm.xlu2 %1290, %v1733_v46   ;;  %483 = vperm.xlu1 %1287, %v388_v47   ;;  %v438_v35 = vpop.permute.xlu1 %437 }
 0x117   :  { %v455_v40 = vmul.f32 %v1196_v34, %v438_v35  ;;  %v662_v27 = vpop.permute.xlu2 %661 }
 0x118   :  { %v1820_v58 = vpop.permute.xlu0 %637  ;;  %v674_v62 = vmul.f32 %v1882_v12, %v662_v27 }
 0x119   :  { %v576_v59 = vadd.f32 %v568_v36, %v455_v40 }
 0x11e   :  { %1291 = vset.pattern.permute.xlu2 %v1377_v18  ;;  %1292 = vset.pattern.permute.xlu1 %v1376_v17 }
 0x11f   :  { %560 = vperm.xlu2 %1291, %v1739_v48   ;;  %697 = vperm.xlu1 %1292, %v388_v47   ;;  %v658_v41 = vpop.permute.xlu1 %657 }
 0x120   :  { %v673_v37 = vmul.f32 %v1212_v14, %v658_v41  ;;  %v537_v3 = vpop.permute.xlu2 %536  ;;  %v379_v41 = vmul.f32 %v371_v32, %v1544_v1 }
 0x121   :  { %v418_v49 = vpop.permute.xlu0 %417  ;;  %v564_v50 = vmul.f32 %v1830_v39, %v537_v3 }
 0x122   :  { %v681_v31 = vadd.f32 %v673_v37, %v576_v59  ;;  %v451_v2 = vmul.f32 %v1836_v44, %v418_v49 }
 0x124   :  { %v1840_v51 = vadd.f32 %v564_v50, %v451_v2  ;;  %v373_v50 = vsub.f32 1.0, %v1809_v29 }
 0x127   :  { %1293 = vset.pattern.permute.xlu2 %v1378_v21  ;;  %1294 = vset.pattern.permute.xlu1 %v1377_v18 }
 0x128   :  { %v601_v48 = vpop.permute.xlu2 %600  ;;  %608 = vperm.xlu1 %1294, %v1745_v53   ;;  %503 = vperm.xlu2 %1293, %v1745_v53   ;;  %v413_v54 = vpop.permute.xlu1 %412 }
 0x129   :  { %v1846_v56 = vpop.permute.xlu0 %427  ;;  %v616_v42 = vmul.f32 %v1204_v5, %v601_v48 }
 0x130   :  { %1296 = vset.pattern.permute.xlu1 %v1379_v28  ;;  %1295 = vset.pattern.permute.xlu2 %v1379_v28 }
 0x131   :  { %v494_v60 = vpop.permute.xlu0 %493  ;;  %v706_v33 = vpop.permute.xlu2 %705  ;;  %794 = vperm.xlu1 %1296, %v1733_v46   ;;  %754 = vperm.xlu2 %1295, %v1689_v63   ;;  %v1870_v63 = vld [vmem:[%s2225_s0 + $0x70] sm:$0xff]  ;;  %v1191_v46 = vld [vmem:[%s2225_s0 + $0x40] sm:$0xff] }
 0x132   :  { %v511_v61 = vmul.f32 %v1196_v34, %v494_v60  ;;  %v721_v4 = vmul.f32 %v1212_v14, %v706_v33  ;;  %v763_v0 = vpop.permute.xlu1 %762  ;;  %v450_v45 = vmul.f32 %v1191_v46, %v413_v54 }
 0x133   :  { %v778_v22 = vmul.f32 %v1853_v57, %v763_v0 }
 0x134   :  { %v624_v7 = vadd.f32 %v616_v42, %v511_v61  ;;  %v571_v30 = vadd.f32 %v563_v25, %v450_v45 }
 0x135   :  { %v1858_v8 = vadd.f32 %v778_v22, %v681_v31 }
 0x136   :  { %v1860_v9 = vadd.f32 %v721_v4, %v624_v7  ;;  %v1221_v7 = vld [vmem:[%s2225_s0 + $0x130] sm:$0xff] }
 0x139   :  { %v469_v38 = vpop.permute.xlu0 %468  ;;  %1297 = vset.pattern.permute.xlu1 %v1376_v17  ;;  %802 = vperm.xlu2 %1295, %v388_v47   ;;  %v1207_v47 = vld [vmem:[%s2225_s0 + $0xc0] sm:$0xff] }
 0x13a   :  { %v581_v15 = vpop.permute.xlu2 %580  ;;  %713 = vperm.xlu1 %1297, %v1745_v53   ;;  %v443_v20 = vpop.permute.xlu1 %442  ;;  %v506_v6 = vmul.f32 %v1191_v46, %v469_v38  ;;  %v668_v5 = vmul.f32 %v1207_v47, %v1820_v58  ;;  %v387_v58 = vmul.f32 %v1752_v55, %v379_v41  ;;  %v381_v55 = vmul.f32 %v373_v50, %v1544_v1  ;;  %v1222_v50 = vld [vmem:[%s2225_s0 + $0x138] sm:$0xff] }
 0x13b   :  { %v611_v16 = vmul.f32 %v1199_v23, %v581_v15  ;;  %v456_v43 = vmul.f32 %v1870_v63, %v443_v20 }
 0x13c   :  { %v676_v40 = vadd.f32 %v668_v5, %v571_v30  ;;  %v389_v54 = vmul.f32 %v1786_v13, %v381_v55  ;;  %v1210_v5 = vld [vmem:[%s2225_s0 + $0xd8] sm:$0xff] }
 0x13d   :  { %v619_v19 = vadd.f32 %v611_v16, %v506_v6  ;;  %v577_v24 = vadd.f32 %v569_v52, %v456_v43  ;;  %v1216_v6 = vld [vmem:[%s2225_s0 + $0x108] sm:$0xff] }
 0x13f   :  { %v1893_v53 = vadd.f32 %v674_v62, %v577_v24  ;;  %v1202_v62 = vld [vmem:[%s2225_s0 + $0x98] sm:$0xff] }
 0x141   :  { %1298 = vset.pattern.permute.xlu2 %v1378_v21  ;;  %v499_v37 = vpop.permute.xlu0 %498 }
 0x142   :  { %1299 = vset.pattern.permute.xlu1 %v1377_v18  ;;  %422 = vperm.xlu2 %1298, %v1771_v10  }
 0x143   :  { %v686_v34 = vpop.permute.xlu2 %685  ;;  %540 = vperm.xlu1 %1299, %v1771_v10   ;;  %v743_v35 = vpop.permute.xlu1 %742 }
 0x144   :  { %v716_v36 = vmul.f32 %v1207_v47, %v686_v34  ;;  %v773_v27 = vmul.f32 %v1215_v26, %v743_v35 }
 0x146   :  { %v724_v59 = vadd.f32 %v716_v36, %v619_v19  ;;  %v781_v14 = vadd.f32 %v773_v27, %v676_v40 }
 0x148   :  { %845 = vrot.lane.b32.xlu0 %v781_v14, %s1380_s23  ;;  %v1214_v14 = vld [vmem:[%s2225_s0 + $0xf8] sm:$0xff] }
 0x14a   :  { %432 = vperm.xlu2 %1298, %v1809_v29   ;;  %v1913_v2 = vpop.permute.xlu0 %584 }
 0x14b   :  { %1300 = vset.pattern.permute.xlu1 %v1378_v21  ;;  %v767_v3 = vpop.permute.xlu1 %766 }
 0x14c   :  { %v605_v49 = vpop.permute.xlu2 %604  ;;  %478 = vperm.xlu1 %1300, %v387_v58   ;;  %v779_v23 = vmul.f32 %v1221_v7, %v767_v3 }
 0x152   :  { %1301 = vset.pattern.permute.xlu2 %v1377_v18 }
 0x153   :  { %548 = vperm.xlu2 %1301, %v1809_v29   ;;  %v650_v42 = vpop.permute.xlu0 %649 }
 0x154   :  { %1302 = vset.pattern.permute.xlu1 %v1377_v18  ;;  %v545_v31 = vpop.permute.xlu1 %544  ;;  %v671_v34 = vmul.f32 %v1210_v5, %v650_v42 }
 0x155   :  { %v1915_v48 = vpop.permute.xlu2 %473  ;;  %588 = vperm.xlu1 %1302, %v387_v58   ;;  %v566_v47 = vmul.f32 %v1202_v62, %v545_v31 }
 0x15b   :  { %1303 = vset.pattern.permute.xlu2 %v1378_v21  ;;  %v666_v1 = vpop.permute.xlu0 %665 }
 0x15c   :  { %488 = vperm.xlu2 %1303, %v389_v54   ;;  %v675_v3 = vmul.f32 %v1214_v14, %v666_v1 }
 0x15d   :  { %596 = vperm.xlu1 %1302, %v389_v54   ;;  %v642_v60 = vpop.permute.xlu1 %641 }
 0x15e   :  { %v815_v33 = vpop.permute.xlu2 %814 }
 0x15f   :  { %v827_v20 = vmul.f32 %v1221_v7, %v815_v33  ;;  %v612_v7 = vmul.f32 %v1830_v39, %v1913_v2  ;;  %v930_v2 = vld [vmem:[%s2227_s2 + $0x58] sm:$0xff] }
 0x160   :  { %964 = vmatpush.msra.mxu0 %v930_v2  ;;  %1233 = vmatpush.msra.mxu3 %v930_v2 }
 0x161   :  { %1232 = vmatpush.msra.mxu1 %v930_v2 }
 0x163   :  { %v1929_v22 = vpop.permute.xlu0 %645 }
 0x164   :  { %1305 = vset.pattern.permute.xlu2 %v1376_v17 }
 0x165   :  { %1306 = vset.pattern.permute.xlu1 %v1376_v17  ;;  %653 = vperm.xlu2 %1305, %v1809_v29   ;;  %v617_v17 = vmul.f32 %v1865_v11, %v605_v49  ;;  %v512_v29 = vmul.f32 %v1870_v63, %v499_v37  ;;  %v787_v63 = vadd.f32 %v779_v23, %v1893_v53 }
 0x166   :  { %693 = vperm.xlu1 %1306, %v387_v58   ;;  %v811_v18 = vpop.permute.xlu1 %810 }
 0x167   :  { %v1923_v61 = vpop.permute.xlu2 %592  ;;  %v625_v38 = vadd.f32 %v617_v17, %v512_v29  ;;  %v826_v19 = vmul.f32 %v1853_v57, %v811_v18  ;;  %v507_v29 = vmul.f32 %v1836_v44, %v1915_v48 }
 0x168   :  { %v614_v49 = vmul.f32 %v1202_v62, %v1923_v61 }
 0x169   :  { %v834_v30 = vadd.f32 %v826_v19, %v1860_v9  ;;  %v1206_v9 = vld [vmem:[%s2225_s0 + $0xb8] sm:$0xff] }
 0x16c   :  { %v747_v16 = vpop.permute.xlu0 %746 }
 0x16d   :  { %701 = vperm.xlu2 %1305, %v389_v54  }
 0x16e   :  { %1307 = vset.pattern.permute.xlu1 %v1379_v28  ;;  %v791_v21 = vpop.permute.xlu1 %790 }
 0x16f   :  { %v821_v13 = vmul.f32 %v1215_v26, %v791_v21  ;;  %750 = vperm.xlu1 %1307, %v1771_v10  }
 0x170   :  { %v1927_v4 = vpop.permute.xlu2 %689 }
 0x171   :  { %v829_v0 = vadd.f32 %v821_v13, %v724_v59 }
 0x174   :  { %v771_v31 = vpop.permute.xlu0 %770 }
 0x175   :  { %1308 = vset.pattern.permute.xlu2 %v1379_v28  ;;  %v1208_v28 = vld [vmem:[%s2225_s0 + $0xc8] sm:$0xff]  ;;  %v780_v18 = vmul.f32 %v1222_v50, %v771_v31 }
 0x176   :  { %798 = vperm.xlu2 %1308, %v387_v58   ;;  %v669_v43 = vmul.f32 %v1208_v28, %v642_v60 }
 0x177   :  { %806 = vperm.xlu1 %1307, %v389_v54   ;;  %v710_v46 = vpop.permute.xlu1 %709 }
 0x178   :  { %v722_v10 = vmul.f32 %v1882_v12, %v710_v46  ;;  %v774_v12 = vmul.f32 %v1216_v6, %v747_v16  ;;  %v677_v24 = vadd.f32 %v669_v43, %v1840_v51  ;;  %v1198_v51 = vld [vmem:[%s2225_s0 + $0x78] sm:$0xff]  ;;  %v717_v46 = vmul.f32 %v1208_v28, %v1927_v4  ;;  %v929_v4 = vld [vmem:[%s2227_s2 + $0x50] sm:$0xff]  ;;  %v928_v28 = vld [vmem:[%s2227_s2 + $0x48] sm:$0xff] }
 0x179   :  { %v561_v15 = vpop.permute.xlu2 %560  ;;  %965 = vmatpush.msra.mxu0 %v929_v4  ;;  %1235 = vmatpush.msra.mxu3 %v929_v4 }
 0x17a   :  { %v730_v52 = vadd.f32 %v722_v10, %v625_v38  ;;  %v782_v53 = vadd.f32 %v774_v12, %v677_v24  ;;  %v570_v40 = vmul.f32 %v1206_v9, %v561_v15  ;;  %v620_v38 = vadd.f32 %v612_v7, %v507_v29  ;;  %1234 = vmatpush.msra.mxu1 %v929_v4  ;;  %v2009_v24 = vld [vmem:[%s2225_s0 + $0xa0] sm:$0xff] }
 0x17b   :  { %966 = vmatpush.msra.mxu0 %v928_v28  ;;  %1237 = vmatpush.msra.mxu3 %v928_v28 }
 0x17c   :  { %v835_v11 = vadd.f32 %v827_v20, %v730_v52  ;;  %v725_v23 = vadd.f32 %v717_v46, %v620_v38  ;;  %v819_v16 = vpop.permute.xlu0 %818  ;;  %1236 = vmatpush.msra.mxu1 %v928_v28 }
 0x17d   :  { %v828_v48 = vmul.f32 %v1222_v50, %v819_v16 }
 0x17e   :  { %855 = vrot.lane.b32.xlu2 %v1858_v8, %s1380_s23  ;;  %889 = vrot.lane.b32.xlu0 %v835_v11, %s1381_s30  ;;  %v1194_v8 = vld [vmem:[%s2225_s0 + $0x58] sm:$0xff] }
 0x17f   :  { %857 = vrot.lane.b32.xlu1 %v787_v63, %s1380_s23  ;;  %v453_v26 = vmul.f32 %v1194_v8, %v1846_v56  ;;  %v1218_v56 = vld [vmem:[%s2225_s0 + $0x118] sm:$0xff] }
 0x180   :  { %v448_v45 = vpop.permute.xlu1 %447 }
 0x181   :  { %v574_v57 = vadd.f32 %v566_v47, %v453_v26  ;;  %v457_v35 = vmul.f32 %v1198_v51, %v448_v45  ;;  %v926_v47 = vld [vmem:[%s2227_s2 + $0x38] sm:$0xff]  ;;  %v925_v26 = vld [vmem:[%s2227_s2 + $0x30] sm:$0xff] }
 0x182   :  { %v504_v25 = vpop.permute.xlu2 %503 }
 0x183   :  { %v679_v27 = vadd.f32 %v671_v34, %v574_v57  ;;  %v578_v41 = vadd.f32 %v570_v40, %v457_v35  ;;  %v513_v63 = vmul.f32 %v1198_v51, %v504_v25  ;;  %v2014_v25 = vld [vmem:[%s2225_s0 + $0x60] sm:$0xff] }
 0x184   :  { %v2035_v57 = vld [vmem:[%s2225_s0 + $0x120] sm:$0xff] }
 0x185   :  { %v683_v54 = vadd.f32 %v675_v3, %v578_v41  ;;  %v921_v41 = vld [vmem:[%s2227_s2 + $0x10] sm:$0xff]  ;;  %v920_v3 = vld [vmem:[%s2227_s2 + $0x8] sm:$0xff] }
 0x186   :  { %847 = vrot.lane.b32.xlu2 %v782_v53, %s1380_s23 }
 0x187   :  { %887 = vrot.lane.b32.xlu1 %v834_v30, %s1381_s30  ;;  %v2026_v30 = vld [vmem:[%s2225_s0 + $0xe0] sm:$0xff] }
 0x188   :  { %v484_v32 = vpop.permute.xlu1 %483 }
 0x189   :  { %v509_v58 = vmul.f32 %v1194_v8, %v484_v32  ;;  %v927_v8 = vld [vmem:[%s2227_s2 + $0x40] sm:$0xff]  ;;  %v759_v32 = vpop.permute.xlu0 %758 }
 0x18a   :  { %967 = vmatpush.msra.mxu0 %v927_v8  ;;  %1239 = vmatpush.msra.mxu3 %v927_v8  ;;  %v777_v40 = vmul.f32 %v2035_v57, %v759_v32 }
 0x18b   :  { %v755_v36 = vpop.permute.xlu2 %754  ;;  %v622_v60 = vadd.f32 %v614_v49, %v509_v58  ;;  %1238 = vmatpush.msra.mxu1 %v927_v8  ;;  %v919_v49 = vld [vmem:[%s2227_s2] sm:$0xff] }
 0x18c   :  { %v776_v59 = vmul.f32 %v1218_v56, %v755_v36  ;;  %968 = vmatpush.msra.mxu0 %v926_v47  ;;  %1241 = vmatpush.msra.mxu3 %v926_v47  ;;  %v923_v36 = vld [vmem:[%s2227_s2 + $0x20] sm:$0xff] }
 0x18d   :  { %1240 = vmatpush.msra.mxu1 %v926_v47  ;;  %v399_v47 = vld [vmem:[%s2225_s0 + $0x30] sm:$0xff] }
 0x18e   :  { %v784_v37 = vadd.f32 %v776_v59, %v679_v27  ;;  %877 = vrot.lane.b32.xlu2 %v829_v0, %s1381_s30  ;;  %v788_v0 = vadd.f32 %v780_v18, %v683_v54  ;;  %969 = vmatpush.msra.mxu0 %v925_v26  ;;  %v1217_v18 = vld [vmem:[%s2225_s0 + $0x110] sm:$0xff] }
 0x18f   :  { %1243 = vmatpush.msra.mxu3 %v925_v26  ;;  %1242 = vmatpush.msra.mxu1 %v925_v26 }
 0x190   :  { %851 = vrot.lane.b32.xlu1 %v784_v37, %s1380_s23 }
 0x191   :  { %v698_v55 = vpop.permute.xlu1 %697 }
 0x192   :  { %v719_v33 = vmul.f32 %v1210_v5, %v698_v55  ;;  %v1201_v55 = vld [vmem:[%s2225_s0 + $0x90] sm:$0xff] }
 0x193   :  { %v803_v42 = vpop.permute.xlu2 %802 }
 0x194   :  { %v727_v21 = vadd.f32 %v719_v33, %v622_v60  ;;  %v824_v13 = vmul.f32 %v1218_v56, %v803_v42  ;;  %v924_v56 = vld [vmem:[%s2227_s2 + $0x28] sm:$0xff]  ;;  %v1193_v60 = vld [vmem:[%s2225_s0 + $0x50] sm:$0xff] }
 0x195   :  { %970 = vmatpush.msra.mxu0 %v924_v56  ;;  %1245 = vmatpush.msra.mxu3 %v924_v56  ;;  %v1209_v42 = vld [vmem:[%s2225_s0 + $0xd0] sm:$0xff] }
 0x196   :  { %v832_v17 = vadd.f32 %v824_v13, %v727_v21  ;;  %1244 = vmatpush.msra.mxu1 %v924_v56  ;;  %v394_v56 = vld [vmem:[%s2225_s0 + $0x8] sm:$0xff] }
 0x197   :  { %971 = vmatpush.msra.mxu0 %v923_v36  ;;  %1247 = vmatpush.msra.mxu3 %v923_v36 }
 0x198   :  { %859 = vrot.lane.b32.xlu1 %v788_v0, %s1380_s23  ;;  %883 = vrot.lane.b32.xlu2 %v832_v17, %s1381_s30 }
 0x199   :  { %1246 = vmatpush.msra.mxu1 %v923_v36 }
 0x19a   :  { %v609_v61 = vpop.permute.xlu1 %608 }
 0x19b   :  { %v618_v11 = vmul.f32 %v1206_v9, %v609_v61 }
 0x19c   :  { %v1984_v1 = vpop.permute.xlu2 %422 }
 0x19d   :  { %v626_v12 = vadd.f32 %v618_v11, %v513_v63  ;;  %v452_v46 = vmul.f32 %v1193_v60, %v1984_v1  ;;  %v393_v1 = vld [vmem:[%s2225_s0] sm:$0xff] }
 0x1a3   :  { %v795_v10 = vpop.permute.xlu1 %794 }
 0x1a4   :  { %v822_v15 = vmul.f32 %v1216_v6, %v795_v10  ;;  %v433_v20 = vpop.permute.xlu2 %432 }
 0x1a5   :  { %v454_v5 = vmul.f32 %v2014_v25, %v433_v20 }
 0x1a6   :  { %v830_v52 = vadd.f32 %v822_v15, %v725_v23  ;;  %v670_v23 = vmul.f32 %v1209_v42, %v1929_v22 }
 0x1a8   :  { %879 = vrot.lane.b32.xlu0 %v830_v52, %s1381_s30 }
 0x1ac   :  { %v714_v43 = vpop.permute.xlu1 %713 }
 0x1ad   :  { %v723_v45 = vmul.f32 %v1214_v14, %v714_v43  ;;  %v549_v44 = vpop.permute.xlu2 %548  ;;  %v922_v14 = vld [vmem:[%s2227_s2 + $0x18] sm:$0xff] }
 0x1ae   :  { %v567_v53 = vmul.f32 %v2009_v24, %v549_v44  ;;  %972 = vmatpush.msra.mxu0 %v922_v14  ;;  %1249 = vmatpush.msra.mxu3 %v922_v14 }
 0x1af   :  { %v731_v62 = vadd.f32 %v723_v45, %v626_v12  ;;  %1248 = vmatpush.msra.mxu1 %v922_v14 }
 0x1b0   :  { %v575_v34 = vadd.f32 %v567_v53, %v454_v5  ;;  %973 = vmatpush.msra.mxu0 %v921_v41  ;;  %1251 = vmatpush.msra.mxu3 %v921_v41 }
 0x1b1   :  { %v836_v39 = vadd.f32 %v828_v48, %v731_v62  ;;  %1250 = vmatpush.msra.mxu1 %v921_v41 }
 0x1b2   :  { %974 = vmatpush.msra.mxu0 %v920_v3  ;;  %1253 = vmatpush.msra.mxu3 %v920_v3 }
 0x1b3   :  { %891 = vrot.lane.b32.xlu0 %v836_v39, %s1381_s30  ;;  %1252 = vmatpush.msra.mxu1 %v920_v3 }
 0x1b4   :  { %975 = vmatpush.msra.mxu0 %v919_v49  ;;  %1255 = vmatpush.msra.mxu3 %v919_v49 }
 0x1b5   :  { %v2002_v6 = vpop.permute.xlu1 %540  ;;  %1254 = vmatpush.msra.mxu1 %v919_v49 }
 0x1b6   :  { %v2004_v19 = vpop.permute.xlu2 %488  ;;  %v565_v61 = vmul.f32 %v1201_v55, %v2002_v6 }
 0x1b7   :  { %v510_v16 = vmul.f32 %v2014_v25, %v2004_v19  ;;  %v398_v19 = vld [vmem:[%s2225_s0 + $0x28] sm:$0xff] }
 0x1b8   :  { %v573_v10 = vadd.f32 %v565_v61, %v452_v46 }
 0x1ba   :  { %v678_v11 = vadd.f32 %v670_v23, %v573_v10  ;;  %v846_v12 = vpop.permute.xlu0 %845  ;;  %v1057_v10 = vld [vmem:[%s2229_s4 + $0x30] sm:$0xff] }
 0x1bb   :  { %v902_v22 = vsel %vm901_vm5, %v393_v1, %v846_v12  ;;  %v1052_v12 = vld [vmem:[%s2229_s4 + $0x8] sm:$0xff] }
 0x1be   :  { %v479_v51 = vpop.permute.xlu1 %478 }
 0x1bf   :  { %v654_v9 = vpop.permute.xlu2 %653  ;;  %v508_v33 = vmul.f32 %v1193_v60, %v479_v51 }
 0x1c0   :  { %v672_v35 = vmul.f32 %v2026_v30, %v654_v9 }
 0x1c2   :  { %v680_v27 = vadd.f32 %v672_v35, %v575_v34 }
 0x1c4   :  { %v785_v59 = vadd.f32 %v777_v40, %v680_v27  ;;  %v400_v40 = vld [vmem:[%s2225_s0 + $0x38] sm:$0xff] }
 0x1c6   :  { %853 = vrot.lane.b32.xlu1 %v785_v59, %s1380_s23 }
 0x1c7   :  { %v702_v58 = vpop.permute.xlu2 %701  ;;  %v589_v37 = vpop.permute.xlu1 %588 }
 0x1c8   :  { %v613_v54 = vmul.f32 %v1201_v55, %v589_v37  ;;  %v720_v44 = vmul.f32 %v2026_v30, %v702_v58  ;;  %v396_v30 = vld [vmem:[%s2225_s0 + $0x18] sm:$0xff]  ;;  %v397_v37 = vld [vmem:[%s2225_s0 + $0x20] sm:$0xff]  ;;  %v395_v55 = vld [vmem:[%s2225_s0 + $0x10] sm:$0xff] }
 0x1ca   :  { %v621_v17 = vadd.f32 %v613_v54, %v508_v33 }
 0x1cf   :  { %v597_v50 = vpop.permute.xlu1 %596 }
 0x1d0   :  { %v799_v31 = vpop.permute.xlu2 %798  ;;  %v615_v52 = vmul.f32 %v2009_v24, %v597_v50 }
 0x1d1   :  { %v823_v29 = vmul.f32 %v1217_v18, %v799_v31 }
 0x1d2   :  { %v623_v45 = vadd.f32 %v615_v52, %v510_v16  ;;  %v1053_v16 = vld [vmem:[%s2229_s4 + $0x10] sm:$0xff] }
 0x1d4   :  { %v728_v2 = vadd.f32 %v720_v44, %v623_v45  ;;  %v1051_v44 = vld [vmem:[%s2229_s4] sm:$0xff] }
 0x1d8   :  { %v856_v21 = vpop.permute.xlu2 %855  ;;  %v694_v13 = vpop.permute.xlu1 %693 }
 0x1d9   :  { %v718_v0 = vmul.f32 %v1209_v42, %v694_v13  ;;  %v907_v24 = vsel %vm901_vm5, %v398_v19, %v856_v21  ;;  %v1309_v13 = vld [vmem:[%s2228_s3] ss:$0 sm:$0xff] }
 0x1db   :  { %v726_v7 = vadd.f32 %v718_v0, %v621_v17 }
 0x1dd   :  { %v831_v38 = vadd.f32 %v823_v29, %v726_v7  ;;  %v1058_v7 = vld [vmem:[%s2229_s4 + $0x38] sm:$0xff] }
 0x1de   :  { %1074 = vmatpush.msrb.mxu1 %v1058_v7 }
 0x1df   :  { %881 = vrot.lane.b32.xlu0 %v831_v38, %s1381_s30 }
 0x1e0   :  { %v848_v15 = vpop.permute.xlu2 %847  ;;  %1075 = vmatpush.msrb.mxu1 %v1057_v10 }
 0x1e1   :  { %v751_v20 = vpop.permute.xlu1 %750  ;;  %v903_v34 = vsel %vm901_vm5, %v394_v56, %v848_v15  ;;  %v1056_v15 = vld [vmem:[%s2229_s4 + $0x28] sm:$0xff] }
 0x1e2   :  { %v775_v63 = vmul.f32 %v1217_v18, %v751_v20  ;;  %v1055_v20 = vld [vmem:[%s2229_s4 + $0x20] sm:$0xff]  ;;  %1076 = vmatpush.msrb.mxu1 %v1056_v15 }
 0x1e4   :  { %v783_v43 = vadd.f32 %v775_v63, %v678_v11  ;;  %v1054_v11 = vld [vmem:[%s2229_s4 + $0x18] sm:$0xff]  ;;  %1077 = vmatpush.msrb.mxu1 %v1055_v20 }
 0x1e6   :  { %849 = vrot.lane.b32.xlu2 %v783_v43, %s1380_s23  ;;  %1078 = vmatpush.msrb.mxu1 %v1054_v11 }
 0x1e8   :  { %v878_v48 = vpop.permute.xlu2 %877  ;;  %1079 = vmatpush.msrb.mxu1 %v1053_v16 }
 0x1e9   :  { %v807_v62 = vpop.permute.xlu1 %806  ;;  %v911_v39 = vsel %vm910_vm6, %v902_v22, %v878_v48 }
 0x1ea   :  { %v825_v4 = vmul.f32 %v2035_v57, %v807_v62  ;;  %1223 = vmatmul.msk.f32.vlgmr.msra.gmra.mxu0 %vm935_vm9, %v911_v39  ;;  %1080 = vmatpush.msrb.mxu1 %v1052_v12  ;;  %v1106_v39 = vld [vmem:[%s2231_s6 + $0x78] sm:$0xff]  ;;  %v1093_v12 = vld [vmem:[%s2231_s6 + $0x10] sm:$0xff] }
 0x1eb   :  { %1111 = vmatpush.msra.mxu2 %v1106_v39 }
 0x1ec   :  { %v833_v28 = vadd.f32 %v825_v4, %v728_v2  ;;  %v1105_v2 = vld [vmem:[%s2231_s6 + $0x70] sm:$0xff]  ;;  %1081 = vmatpush.msrb.mxu1 %v1051_v44  ;;  %v1310_v44 = vld [vmem:[%s2230_s5] ss:$0 sm:$0xff]  ;;  %s1382_s5 = smov [#allocation2]  }
 0x1ed   :  { %1112 = vmatpush.msra.mxu2 %v1105_v2 }
 0x1ee   :  { %885 = vrot.lane.b32.xlu2 %v833_v28, %s1381_s30 }
 0x1f0   :  { %v890_v26 = vpop.permute.xlu0 %889 }
 0x1f1   :  { %v858_v6 = vpop.permute.xlu1 %857 }
 0x1f2   :  { %v908_v53 = vsel %vm901_vm5, %v399_v47, %v858_v6  ;;  %v884_v57 = vpop.permute.xlu2 %883 }
 0x1f3   :  { %v917_v51 = vsel %vm910_vm6, %v908_v53, %v890_v26 }
 0x1f9   :  { %v888_v25 = vpop.permute.xlu1 %887 }
 0x1fa   :  { %v916_v8 = vsel %vm910_vm6, %v907_v24, %v888_v25  ;;  %v1104_v24 = vld [vmem:[%s2231_s6 + $0x68] sm:$0xff] }
 0x1fb   :  { %1228 = vmatmul.msk.f32.vlgmr.msra.gmra.mxu3 %vm935_vm9, %v916_v8  ;;  %1113 = vmatpush.msra.mxu2 %v1104_v24 }
 0x202   :  { %v852_v5 = vpop.permute.xlu1 %851 }
 0x203   :  { %v905_v32 = vsel %vm901_vm5, %v396_v30, %v852_v5  ;;  %1229 = vmatmul.msk.f32.gmra.mxu3 %vm935_vm9, %v917_v51  ;;  %v1103_v30 = vld [vmem:[%s2231_s6 + $0x60] sm:$0xff] }
 0x204   :  { %v914_v9 = vsel %vm910_vm6, %v905_v32, %v884_v57  ;;  %1114 = vmatpush.msra.mxu2 %v1103_v30 }
 0x205   :  { %1226 = vmatmul.msk.f32.vlgmr.msra.gmra.mxu1 %vm935_vm9, %v914_v9  ;;  %v1102_v9 = vld [vmem:[%s2231_s6 + $0x58] sm:$0xff] }
 0x206   :  { %1115 = vmatpush.msra.mxu2 %v1102_v9 }
 0x20a   :  { %v860_v27 = vpop.permute.xlu1 %859 }
 0x20b   :  { %v909_v59 = vsel %vm901_vm5, %v400_v40, %v860_v27  ;;  %v1100_v27 = vld [vmem:[%s2231_s6 + $0x48] sm:$0xff] }
 0x21a   :  { %v880_v35 = vpop.permute.xlu0 %879 }
 0x21b   :  { %v912_v36 = vsel %vm910_vm6, %v903_v34, %v880_v35  ;;  %v1101_v35 = vld [vmem:[%s2231_s6 + $0x50] sm:$0xff] }
 0x21c   :  { %1224 = vmatmul.msk.f32.gmra.mxu0 %vm935_vm9, %v912_v36  ;;  %1116 = vmatpush.msra.mxu2 %v1101_v35 }
 0x21e   :  { %1117 = vmatpush.msra.mxu2 %v1100_v27 }
 0x225   :  { %v892_v14 = vpop.permute.xlu0 %891 }
 0x226   :  { %v918_v41 = vsel %vm910_vm6, %v909_v59, %v892_v14 }
 0x227   :  { %1230 = vmatmul.msk.f32.gmra.mxu3 %vm935_vm9, %v918_v41  ;;  %v1099_v41 = vld [vmem:[%s2231_s6 + $0x40] sm:$0xff] }
 0x228   :  { %1118 = vmatpush.msra.mxu2 %v1099_v41 }
 0x238   :  { %v854_v3 = vpop.permute.xlu1 %853 }
 0x239   :  { %v906_v49 = vsel %vm901_vm5, %v397_v37, %v854_v3 }
 0x240   :  { %v850_v58 = vpop.permute.xlu2 %849 }
 0x241   :  { %v904_v54 = vsel %vm901_vm5, %v395_v55, %v850_v58 }
 0x248   :  { %v886_v50 = vpop.permute.xlu2 %885 }
 0x249   :  { %v915_v31 = vsel %vm910_vm6, %v906_v49, %v886_v50  ;;  %v1098_v50 = vld [vmem:[%s2231_s6 + $0x38] sm:$0xff] }
 0x24a   :  { %1227 = vmatmul.msk.f32.gmra.mxu1 %vm935_vm9, %v915_v31  ;;  %1119 = vmatpush.msra.mxu2 %v1098_v50 }
 0x251   :  { %v882_v60 = vpop.permute.xlu0 %881 }
 0x252   :  { %v913_v33 = vsel %vm910_vm6, %v904_v54, %v882_v60  ;;  %v1097_v60 = vld [vmem:[%s2231_s6 + $0x30] sm:$0xff] }
 0x253   :  { %1225 = vmatmul.msk.f32.gmra.mxu0 %vm935_vm9, %v913_v33  ;;  %1120 = vmatpush.msra.mxu2 %v1097_v60 }
 0x267   :  { %v977_v18 = vpop.f32.mrf.mxu0 }
 0x268   :  { %v978_v46 = vadd.f32 %v1309_v13, %v977_v18  ;;  %v1096_v18 = vld [vmem:[%s2231_s6 + $0x28] sm:$0xff] }
 0x269   :  { %1121 = vmatpush.msra.mxu2 %v1096_v18 }
 0x27e   :  { %v992_v42 = vpop.f32.mrf.mxu3 }
 0x27f   :  { %v993_v52 = vadd.f32 %v1309_v13, %v992_v42 }
 0x282   :  { %v986_v61 = vpop.f32.mrf.mxu1 }
 0x283   :  { %v987_v48 = vadd.f32 %v1309_v13, %v986_v61 }
 0x286   :  { %v995_v21 = vpop.f32.mrf.mxu3 }
 0x287   :  { %v996_v23 = vadd.f32 %v1309_v13, %v995_v21 }
 0x299   :  { %v980_v17 = vpop.f32.mrf.mxu0 }
 0x29a   :  { %v981_v29 = vadd.f32 %v1309_v13, %v980_v17 }
 0x29c   :  { %1328 = vtanh.f32 %v981_v29 }
 0x29d   :  { %1330 = vtanh.f32 %v978_v46 }
 0x2a2   :  { %v1329_v1 = vpop.eup %1328 }
 0x2a3   :  { %v1331_v45 = vpop.eup %1330  ;;  %v1010_v62 = vsel %vm910_vm6, %v1329_v1, -inf  ;;  %v1094_v1 = vld [vmem:[%s2231_s6 + $0x18] sm:$0xff] }
 0x2a4   :  { %v1009_v6 = vsel %vm910_vm6, %v1331_v45, -inf  ;;  %v1092_v45 = vld [vmem:[%s2231_s6 + $0x8] sm:$0xff] }
 0x2a5   :  { %v1011_v25 = vmax.f32 %v1009_v6, %v1010_v62 }
 0x2a7   :  { %v1012_v56 = vrot.slane %v1011_v25, 4 }
 0x2a9   :  { %v1013_v59 = vmax.f32 %v1011_v25, %v1012_v56 }
 0x2aa   :  { %v998_v0 = vpop.f32.mrf.mxu3 }
 0x2ab   :  { %v999_v38 = vadd.f32 %v1309_v13, %v998_v0  ;;  %v1014_v31 = vrot.slane %v1013_v59, 2 }
 0x2ad   :  { %1332 = vtanh.f32 %v999_v38  ;;  %v1015_v21 = vmax.f32 %v1013_v59, %v1014_v31 }
 0x2ae   :  { %1334 = vtanh.f32 %v996_v23 }
 0x2af   :  { %1336 = vtanh.f32 %v993_v52  ;;  %v1016_v7 = vrot.slane %v1015_v21, 1 }
 0x2b1   :  { %v1017_v23 = vmax.f32 %v1015_v21, %v1016_v7 }
 0x2b3   :  { %v1333_v22 = vpop.eup %1332 }
 0x2b4   :  { %v1335_v4 = vpop.eup %1334  ;;  %v1037_v19 = vsel %vm910_vm6, %v1333_v22, -inf  ;;  %v1091_v22 = vld [vmem:[%s2231_s6] sm:$0xff] }
 0x2b5   :  { %v1337_v28 = vpop.eup %1336  ;;  %v1036_v47 = vsel %vm910_vm6, %v1335_v4, -inf }
 0x2b6   :  { %v1028_v26 = vsel %vm910_vm6, %v1337_v28, -inf  ;;  %v1038_v5 = vmax.f32 %v1036_v47, %v1037_v19  ;;  %v1311_v28 = vld [vmem:[%s2232_s7] ss:$0 sm:$0xff] }
 0x2b8   :  { %v1039_v36 = vrot.slane %v1038_v5, 4 }
 0x2ba   :  { %v1040_v37 = vmax.f32 %v1038_v5, %v1039_v36 }
 0x2bc   :  { %v1041_v42 = vrot.slane %v1040_v37, 2 }
 0x2be   :  { %v1042_v61 = vmax.f32 %v1040_v37, %v1041_v42 }
 0x2c0   :  { %v1043_v10 = vrot.slane %v1042_v61, 1 }
 0x2c2   :  { %v1044_v52 = vmax.f32 %v1042_v61, %v1043_v10 }
 0x2c7   :  { %v989_v63 = vpop.f32.mrf.mxu1 }
 0x2c8   :  { %v990_v43 = vadd.f32 %v1309_v13, %v989_v63 }
 0x2ca   :  { %1338 = vtanh.f32 %v990_v43  ;;  %v1095_v43 = vld [vmem:[%s2231_s6 + $0x20] sm:$0xff]  ;;  %s1162_s6 = sshll.u32 %s1382_s5, 4  ;;  %s1163_s6 = int_to_ptr.vmem [resolvable:$true] %s1162_s6 }
 0x2cb   :  { %1340 = vtanh.f32 %v987_v48  ;;  %1122 = vmatpush.msra.mxu2 %v1095_v43 }
 0x2cd   :  { %1123 = vmatpush.msra.mxu2 %v1094_v1 }
 0x2cf   :  { %1124 = vmatpush.msra.mxu2 %v1093_v12 }
 0x2d0   :  { %v1339_v8 = vpop.eup %1338  ;;  %v983_v53 = vpop.f32.mrf.mxu0 }
 0x2d1   :  { %v1027_v51 = vsel %vm910_vm6, %v1339_v8, -inf  ;;  %v984_v57 = vadd.f32 %v1309_v13, %v983_v53  ;;  %v1341_v40 = vpop.eup %1340  ;;  %1125 = vmatpush.msra.mxu2 %v1092_v45 }
 0x2d2   :  { %v1029_v32 = vmax.f32 %v1027_v51, %v1028_v26  ;;  %v1019_v3 = vsel %vm910_vm6, %v1341_v40, -inf }
 0x2d3   :  { %1342 = vtanh.f32 %v984_v57  ;;  %1126 = vmatpush.msra.mxu2 %v1091_v22 }
 0x2d4   :  { %v1030_v34 = vrot.slane %v1029_v32, 4 }
 0x2d6   :  { %v1031_v14 = vmax.f32 %v1029_v32, %v1030_v34 }
 0x2d8   :  { %v1032_v54 = vrot.slane %v1031_v14, 2 }
 0x2d9   :  { %v1343_v58 = vpop.eup %1342 }
 0x2da   :  { %v1018_v49 = vsel %vm910_vm6, %v1343_v58, -inf  ;;  %v1033_v17 = vmax.f32 %v1031_v14, %v1032_v54 }
 0x2db   :  { %v1020_v55 = vmax.f32 %v1018_v49, %v1019_v3 }
 0x2dc   :  { %v1034_v46 = vrot.slane %v1033_v17, 1 }
 0x2dd   :  { %v1021_v33 = vrot.slane %v1020_v55, 4 }
 0x2de   :  { %v1035_v20 = vmax.f32 %v1033_v17, %v1034_v46 }
 0x2df   :  { %v1022_v13 = vmax.f32 %v1020_v55, %v1021_v33 }
 0x2e1   :  { %v1023_v0 = vrot.slane %v1022_v13, 2 }
 0x2e3   :  { %v1024_v29 = vmax.f32 %v1022_v13, %v1023_v0 }
 0x2e5   :  { %v1025_v38 = vrot.slane %v1024_v29, 1 }
 0x2e7   :  { %v1026_v15 = vmax.f32 %v1024_v29, %v1025_v38 }
 0x2e9   :  { %v1046_v11 = vsel %vm1045_vm10, %v1017_v23, %v1026_v15 }
 0x2ea   :  { %v1048_v63 = vsel %vm1047_vm11, %v1046_v11, %v1035_v20 }
 0x2eb   :  { %v1050_v16 = vsel %vm1049_vm12, %v1048_v63, %v1044_v52 }
 0x2ec   :  { %1231 = vmatmul.msk.f32.vlgmr.msrb.gmra.mxu1 %vm910_vm6, %v1050_v16 }
 0x369   :  { %v1083_v48 = vpop.f32.mrf.mxu1 }
 0x36a   :  { %v1084_v62 = vadd.f32 %v1310_v44, %v1083_v48 }
 0x36c   :  { %v1087_v39 = vrot.slane %v1084_v62, 2 }
 0x36e   :  { %v1089_v2 = vsub.f32 %v1084_v62, %v1087_v39 }
 0x370   :  { %v1090_v4 = vand.u32 2147483647, %v1089_v2 }
 0x372   :  { %1127 = vmatmul.f32.vlgmr.msra.gmra.mxu2 %v1090_v4 }
 0x3f5   :  { %v1128_v6 = vpop.f32.mrf.mxu2 }
 0x3f6   :  { %v1129_v19 = vadd.f32 %v1311_v28, %v1128_v6 }
 0x3f8   :  { %v1132_v24 = vsel %vm1131_vm13, %v1129_v19, -inf }
 0x3f9   :  { %1133 = vmax.xlane.f32.xlu1 %v1132_v24 }
 0x46c   :  { %v1134_v25 = vpop.xlane.xlu1 %1133 }
 0x46d   :  { %v1135_v8 = vsub.f32 %v1129_v19, %v1134_v25 }
 0x46f   :  { %v1136_v47 = vmul.f32 1.442695, %v1135_v8 }
 0x471   :  { %1344 = vpow2.f32 %v1136_v47 }
 0x477   :  { %v1345_v53 = vpop.eup %1344 }
 0x478   :  { %v1138_v30 = vsel %vm1131_vm13, %v1345_v53, 0.0 }
 0x479   :  { %1139 = vadd.xlane.f32.xlu0 %v1138_v30 }
 0x4ec   :  { %v1140_v26 = vpop.xlane.xlu0 %1139 }
 0x4ed   :  { %1346 = vrcp.f32 %v1140_v26  ;;  %v1152_v32 = vand.u32 2147483648, %v1140_v26  ;;  %v1150_v56 = vand.u32 2147483647, %v1140_v26  ;;  %vm1146_vm15 = vweird.f32 %v1140_v26 }
 0x4ef   :  { %v1153_v35 = vor.u32 1.1754944e-38, %v1152_v32  ;;  %vm1151_vm0 = vcmp.eq.f32.partialorder %v1150_v56, 8.507059e+37 }
 0x4f3   :  { %v1347_v5 = vpop.eup %1346 }
 0x4f4   :  { %v1142_v51 = vmul.f32 %v1347_v5, %v1140_v26  ;;  %vm1147_vm14 = vweird.f32 %v1347_v5 }
 0x4f5   :  { %vm1148_vm7 = vmor %vm1146_vm15, %vm1147_vm14 }
 0x4f6   :  { %v1143_v57 = vsub.f32 1.0, %v1142_v51 }
 0x4f8   :  { %v1144_v9 = vmul.f32 %v1347_v5, %v1143_v57 }
 0x4fa   :  { %v1145_v34 = vadd.f32 %v1347_v5, %v1144_v9 }
 0x4fc   :  { %v1149_v36 = vsel %vm1148_vm7, %v1347_v5, %v1145_v34 }
 0x4fd   :  { %v1154_v40 = vsel %vm1151_vm0, %v1153_v35, %v1149_v36 }
 0x4fe   :  { %v1155_v27 = vmul.f32 %v1345_v53, %v1154_v40 }
 0x500   :  { %1156 = vst.msk [vmem:[#allocation2] sm:$0x3] %vm1131_vm13, %v1155_v27 }
 0x501   :  { %1167 = dma.vmem_to_hbm [thread:$0]  %s1163_s6, 32, %s1165_s16, [#allocation3]  }
 0x502   :  { %1372 = dma.done.wait [#allocation3], 32  }
 0x503   :  { %1373 = vsyncadd [#allocation3], 4294967264 }
 0x504   :  { %1172 = vsyncpa [#allocation3], 1 }

</bundles_post_ra>
